<compile_context>
chip_gen: v7x
topology: tpu7x:2x2x1
jax: 0.10.0
libtpu: 0.0.40
codegen_flags: <defaults>
</compile_context>

<pallas_src>
import functools

import jax
import jax.numpy as jnp
import numpy as np
from jax import lax
from jax.experimental import pallas as pl
from jax.experimental.pallas import tpu as pltpu


# ------------------------------ fused kernel -------------------------------- #

def _ff_policy_kernel(x_ref, w1_ref, b1_ref, w2_ref, b2_ref, w3_ref, b3_ref,
                      wfc_ref, bfc_ref, wh_ref, bh_ref, out_ref):
    """Whole FFPolicy forward for one batch tile.

    x_ref  : (Bt, 100) f32      input, flattened 10x10 board (idx = y*10 + x)
    w*_ref : dense conv-as-matmul weights, bf16
               w1 (100, 1024)   w2 (1024, 576)   w3 (576, 256)
    b*_ref : (1, N) f32 lane-tiled biases
    wfc_ref: (256, 32) bf16, bfc_ref: (1, 32) f32
    wh_ref : (32, 128) bf16   pi|v head zero-padded to 128 lanes
    bh_ref : (1, 128)  f32
    out_ref: (Bt, 128) f32    [:, :A] = pi logits, [:, A] = value, rest = 0
    """

    def layer(a_bf16, w_ref, b_ref):
        # one MXU matmul, f32 accumulation + bias + ReLU, then a single bf16 cast
        y = jnp.dot(a_bf16, w_ref[...], preferred_element_type=jnp.float32)
        return jnp.maximum(y + b_ref[...], 0.0).astype(jnp.bfloat16)

    h = x_ref[...].astype(jnp.bfloat16)       # (bt, 100)
    h = layer(h, w1_ref, b1_ref)              # conv1 -> (bt, 1024)  [8*8*16, HWC]
    h = layer(h, w2_ref, b2_ref)              # conv2 -> (bt, 576)   [6*6*16]
    h = layer(h, w3_ref, b3_ref)              # conv3 -> (bt, 256)   [4*4*16]
    h = layer(h, wfc_ref, bfc_ref)            # fc    -> (bt, 32)

    # merged pi|v head, 128-lane padded output slab -> unmasked lane-dense stores
    out_ref[...] = (jnp.dot(h, wh_ref[...], preferred_element_type=jnp.float32)
                    + bh_ref[...])


# -------------------- one-time weight preprocessing ------------------------- #

def _conv3x3_dense(w_oihw, bias, hi, wi, dtype):
    """Express a VALID 3x3 conv as one dense (Hi*Wi*Cin, Ho*Wo*Cout) matmul weight.

    Activation layout (both input and output): flat index = (y*W + x)*C + c.
    Host-side, one-time (off the hot path).
    """
    w = np.asarray(w_oihw, dtype=np.float32)          # (cout, cin, 3, 3)
    cout, cin = int(w.shape[0]), int(w.shape[1])
    ho, wo = hi - 2, wi - 2
    dense = np.zeros((hi * wi * cin, ho * wo * cout), np.float32)
    for yo in range(ho):
        for xo in range(wo):
            col = (yo * wo + xo) * cout
            for dy in range(3):
                for dx in range(3):
                    row = ((yo + dy) * wi + (xo + dx)) * cin
                    dense[row:row + cin, col:col + cout] = w[:, :, dy, dx].T
    b = np.tile(np.asarray(bias, np.float32), ho * wo).reshape(1, -1)
    return jnp.asarray(dense, dtype=dtype), jnp.asarray(b, jnp.float32)


def prepare_ff_params(params, dtype=jnp.bfloat16):
    """Pack PyTorch-layout weights once (off the hot path) for the fused kernel."""
    w1, b1 = _conv3x3_dense(params['conv1_w'], params['conv1_b'], 10, 10, dtype)
    w2, b2 = _conv3x3_dense(params['conv2_w'], params['conv2_b'], 8, 8, dtype)
    w3, b3 = _conv3x3_dense(params['conv3_w'], params['conv3_b'], 6, 6, dtype)

    # fc: torch flat index f = c*16 + y*4 + x  ->  our layout (y*4 + x)*16 + c
    wfc = jnp.transpose(params['fc_w'].reshape(32, 16, 4, 4),
                        (2, 3, 1, 0)).reshape(256, 32).astype(dtype)
    bfc = params['fc_b'].reshape(1, 32).astype(jnp.float32)

    # merged pi|v head, zero-padded to 128 output lanes (lane-dense output slab)
    a = int(params['pi_w'].shape[0])
    n_lanes = max(128, ((a + 1 + 127) // 128) * 128)
    wh = jnp.concatenate([params['pi_w'].T, params['v_w'].T], axis=1)   # (32, A+1)
    bh = jnp.concatenate([params['pi_b'], params['v_b']])               # (A+1,)
    pad = n_lanes - (a + 1)
    wh = jnp.pad(wh, ((0, 0), (0, pad))).astype(dtype)
    bh = jnp.pad(bh, (0, pad)).reshape(1, -1).astype(jnp.float32)

    return {'w1': w1, 'b1': b1, 'w2': w2, 'b2': b2, 'w3': w3, 'b3': b3,
            'wfc': wfc, 'bfc': bfc, 'wh': wh, 'bh': bh}


# ------------------------------- forward ------------------------------------ #

def _round_up(v, m):
    return ((v + m - 1) // m) * m


def _auto_block_b(batch):
    # multiple of 16 (bf16 sublane packing); small B -> single grid step;
    # mid-size B -> >=2 grid steps so both v7x TensorCores get work.
    if batch <= 32:
        return max(16, _round_up(batch, 16))
    if batch <= 256:
        return _round_up((batch + 1) // 2, 16)
    return 128


def ff_policy_forward(prep, x, *, num_actions, block_b=None):
    """x: (B, 10, 10) f32 -> (pi_logits (B, A), value (B, 1))."""
    B = x.shape[0]
    n_out = int(prep['wh'].shape[1])              # 128 (padded head width)

    if block_b is None:
        block_b = _auto_block_b(B)
    block_b = max(16, _round_up(block_b, 16))

    grid_b = pl.cdiv(B, block_b)
    b_pad = grid_b * block_b

    # layout plumbing only: flatten the board (contiguous reshape, no transpose)
    xf = x.reshape(B, 100)
    if b_pad != B:
        xf = jnp.pad(xf, ((0, b_pad - B), (0, 0)))

    w_names = ('w1', 'b1', 'w2', 'b2', 'w3', 'b3', 'wfc', 'bfc', 'wh', 'bh')
    flops_row = 2 * sum(int(prep[k].shape[0]) * int(prep[k].shape[1])
                        for k in ('w1', 'w2', 'w3', 'wfc', 'wh'))
    bytes_accessed = (int(xf.size) * 4
                      + sum(int(prep[k].size) * prep[k].dtype.itemsize for k in w_names)
                      + int(b_pad * n_out) * 4)

    def full(name):
        shape = tuple(int(s) for s in prep[name].shape)
        return pl.BlockSpec(shape, lambda i: tuple(0 for _ in shape))

    out = pl.pallas_call(
        _ff_policy_kernel,
        out_shape=jax.ShapeDtypeStruct((b_pad, n_out), jnp.float32),
        grid_spec=pltpu.PrefetchScalarGridSpec(
            num_scalar_prefetch=0,
            grid=(grid_b,),
            in_specs=[pl.BlockSpec((block_b, 100), lambda i: (i, 0))]   # x tile
                     + [full(k) for k in w_names],                      # grid-invariant
            out_specs=pl.BlockSpec((block_b, n_out), lambda i: (i, 0)),
        ),
        compiler_params=pltpu.CompilerParams(
            dimension_semantics=("parallel",)),
        cost_estimate=pl.CostEstimate(flops=int(flops_row) * int(b_pad),
                                      transcendentals=0,
                                      bytes_accessed=int(bytes_accessed)),
    )(xf, *(prep[k] for k in w_names))

    # TODO(synk): torch.distributions.Categorical has no Pallas equivalent; we return
    # its parameters (raw logits) plus the value head.
    return out[:B, :num_actions], out[:B, num_actions:num_actions + 1]


# -------------------------- deterministic params ---------------------------- #

def init_params(key, output_size):
    ks = jax.random.split(key, 12)

    def u(k, shape, fan_in):
        bound = 1.0 / float(np.sqrt(fan_in))
        return jax.random.uniform(k, shape, jnp.float32, -bound, bound)

    return {
        'conv1_w': u(ks[0], (16, 1, 3, 3), 1 * 9),
        'conv1_b': u(ks[1], (16,), 1 * 9),
        'conv2_w': u(ks[2], (16, 16, 3, 3), 16 * 9),
        'conv2_b': u(ks[3], (16,), 16 * 9),
        'conv3_w': u(ks[4], (16, 16, 3, 3), 16 * 9),
        'conv3_b': u(ks[5], (16,), 16 * 9),
        'fc_w':    u(ks[6], (32, 4 * 4 * 16), 4 * 4 * 16),
        'fc_b':    u(ks[7], (32,), 4 * 4 * 16),
        'pi_w':    u(ks[8], (output_size, 32), 32),
        'pi_b':    u(ks[9], (output_size,), 32),
        'v_w':     u(ks[10], (1, 32), 32),
        'v_b':     u(ks[11], (1,), 32),
    }


# --------------------------- pure-JAX reference ----------------------------- #

def reference_forward(params, x):
    h = x[:, None, :, :]

    def conv(h, w, b):
        out = lax.conv_general_dilated(
            h, w, (1, 1), 'VALID',
            dimension_numbers=('NCHW', 'OIHW', 'NCHW'),
            precision=lax.Precision.HIGHEST)
        return jax.nn.relu(out + b[None, :, None, None])

    h = conv(h, params['conv1_w'], params['conv1_b'])
    h = conv(h, params['conv2_w'], params['conv2_b'])
    h = conv(h, params['conv3_w'], params['conv3_b'])
    h = h.reshape(h.shape[0], -1)
    h = jax.nn.relu(
        jnp.dot(h, params['fc_w'].T, precision=lax.Precision.HIGHEST)
        + params['fc_b'])
    logits = jnp.dot(h, params['pi_w'].T, precision=lax.Precision.HIGHEST) + params['pi_b']
    value = jnp.dot(h, params['v_w'].T, precision=lax.Precision.HIGHEST) + params['v_b']
    return logits, value


if __name__ == "__main__":
    key = jax.random.PRNGKey(0)
    k_param, k_x1, k_x2 = jax.random.split(key, 3)

    output_size = 4
    params = init_params(k_param, output_size)
    prep = prepare_ff_params(params)          # one-time weight packing, off hot path

    fwd = jax.jit(functools.partial(ff_policy_forward, num_actions=output_size))

    # fc expects 4*4*16 features after three 3x3 valid convs -> 10x10 input.
    # Case 1: tiny batch (single grid step).
    x1 = jax.random.normal(k_x1, (2, 10, 10), jnp.float32)
    logits1, value1 = fwd(prep, x1)
    jax.block_until_ready((logits1, value1))
    assert logits1.shape == (2, output_size) and value1.shape == (2, 1)

    ref_logits1, ref_value1 = reference_forward(params, x1)
    # bf16 MXU operands with f32 accumulation: errors are ~1e-3 here; 2e-2 is ample.
    np.testing.assert_allclose(np.asarray(logits1), np.asarray(ref_logits1),
                               rtol=2e-2, atol=2e-2)
    np.testing.assert_allclose(np.asarray(value1), np.asarray(ref_value1),
                               rtol=2e-2, atol=2e-2)

    # Case 2: mid-size batch -> 2 grid steps (exercises batch tiling / padding path).
    x2 = jax.random.normal(k_x2, (40, 10, 10), jnp.float32)
    logits2, value2 = fwd(prep, x2)
    jax.block_until_ready((logits2, value2))
    assert logits2.shape == (40, output_size) and value2.shape == (40, 1)

    ref_logits2, ref_value2 = reference_forward(params, x2)
    np.testing.assert_allclose(np.asarray(logits2), np.asarray(ref_logits2),
                               rtol=2e-2, atol=2e-2)
    np.testing.assert_allclose(np.asarray(value2), np.asarray(ref_value2),
                               rtol=2e-2, atol=2e-2)

    print("KERNEL_OK")
</pallas_src>

<mosaic_0001>
module attributes {stable_mosaic.version = 11 : i64} {
  func.func @_ff_policy_kernel(%arg0: i32, %arg1: memref<16x100xf32, #tpu.memory_space<vmem>>, %arg2: memref<100x1024xbf16, #tpu.memory_space<vmem>>, %arg3: memref<1x1024xf32, #tpu.memory_space<vmem>>, %arg4: memref<1024x576xbf16, #tpu.memory_space<vmem>>, %arg5: memref<1x576xf32, #tpu.memory_space<vmem>>, %arg6: memref<576x256xbf16, #tpu.memory_space<vmem>>, %arg7: memref<1x256xf32, #tpu.memory_space<vmem>>, %arg8: memref<256x32xbf16, #tpu.memory_space<vmem>>, %arg9: memref<1x32xf32, #tpu.memory_space<vmem>>, %arg10: memref<32x128xbf16, #tpu.memory_space<vmem>>, %arg11: memref<1x128xf32, #tpu.memory_space<vmem>>, %arg12: memref<16x128xf32, #tpu.memory_space<vmem>>) attributes {dimension_semantics = [#tpu.dimension_semantics<parallel>], iteration_bounds = array<i64: 1>, scalar_prefetch = 0 : i64, scratch_operands = 0 : i64, tpu.core_type = #tpu.core_type<tc>, window_params = [{transform_indices = @transform_0, window_bounds = array<i64: 16, 100>}, {pipeline_mode = #tpu.pipeline_mode<synchronous>, transform_indices = @transform_1, window_bounds = array<i64: 100, 1024>}, {pipeline_mode = #tpu.pipeline_mode<synchronous>, transform_indices = @transform_2, window_bounds = array<i64: 1, 1024>}, {pipeline_mode = #tpu.pipeline_mode<synchronous>, transform_indices = @transform_3, window_bounds = array<i64: 1024, 576>}, {pipeline_mode = #tpu.pipeline_mode<synchronous>, transform_indices = @transform_4, window_bounds = array<i64: 1, 576>}, {pipeline_mode = #tpu.pipeline_mode<synchronous>, transform_indices = @transform_5, window_bounds = array<i64: 576, 256>}, {pipeline_mode = #tpu.pipeline_mode<synchronous>, transform_indices = @transform_6, window_bounds = array<i64: 1, 256>}, {pipeline_mode = #tpu.pipeline_mode<synchronous>, transform_indices = @transform_7, window_bounds = array<i64: 256, 32>}, {pipeline_mode = #tpu.pipeline_mode<synchronous>, transform_indices = @transform_8, window_bounds = array<i64: 1, 32>}, {pipeline_mode = #tpu.pipeline_mode<synchronous>, transform_indices = @transform_9, window_bounds = array<i64: 32, 128>}, {pipeline_mode = #tpu.pipeline_mode<synchronous>, transform_indices = @transform_10, window_bounds = array<i64: 1, 128>}, {transform_indices = @transform_11, window_bounds = array<i64: 16, 128>}]} {
    %c0 = arith.constant 0 : index
    %c0_0 = arith.constant 0 : index
    %0 = vector.load %arg1[%c0, %c0_0] : memref<16x100xf32, #tpu.memory_space<vmem>>, vector<16x100xf32>
    %1 = arith.truncf %0 : vector<16x100xf32> to vector<16x100xbf16>
    %c0_1 = arith.constant 0 : index
    %c0_2 = arith.constant 0 : index
    %2 = vector.load %arg2[%c0_1, %c0_2] : memref<100x1024xbf16, #tpu.memory_space<vmem>>, vector<100x1024xbf16>
    %cst = arith.constant dense<0.000000e+00> : vector<16x1024xf32>
    %3 = tpu.matmul %1, %2, %cst {dimension_numbers = #tpu.dot_dimension_numbers<[1], [0], [0], [1], [0, 0, 1, 1], [], []>} : vector<16x100xbf16>, vector<100x1024xbf16>, vector<16x1024xf32> -> vector<16x1024xf32>
    %c0_3 = arith.constant 0 : index
    %c0_4 = arith.constant 0 : index
    %4 = vector.load %arg3[%c0_3, %c0_4] : memref<1x1024xf32, #tpu.memory_space<vmem>>, vector<1x1024xf32>
    %5 = vector.broadcast %4 : vector<1x1024xf32> to vector<16x1024xf32>
    %6 = arith.addf %3, %5 : vector<16x1024xf32>
    %cst_5 = arith.constant 0.000000e+00 : f32
    %7 = vector.broadcast %cst_5 : f32 to vector<16x1024xf32>
    %8 = arith.maximumf %6, %7 : vector<16x1024xf32>
    %9 = arith.truncf %8 : vector<16x1024xf32> to vector<16x1024xbf16>
    %c0_6 = arith.constant 0 : index
    %c0_7 = arith.constant 0 : index
    %10 = vector.load %arg4[%c0_6, %c0_7] : memref<1024x576xbf16, #tpu.memory_space<vmem>>, vector<1024x576xbf16>
    %cst_8 = arith.constant dense<0.000000e+00> : vector<16x576xf32>
    %11 = tpu.matmul %9, %10, %cst_8 {dimension_numbers = #tpu.dot_dimension_numbers<[1], [0], [0], [1], [0, 0, 1, 1], [], []>} : vector<16x1024xbf16>, vector<1024x576xbf16>, vector<16x576xf32> -> vector<16x576xf32>
    %c0_9 = arith.constant 0 : index
    %c0_10 = arith.constant 0 : index
    %12 = vector.load %arg5[%c0_9, %c0_10] : memref<1x576xf32, #tpu.memory_space<vmem>>, vector<1x576xf32>
    %13 = vector.broadcast %12 : vector<1x576xf32> to vector<16x576xf32>
    %14 = arith.addf %11, %13 : vector<16x576xf32>
    %cst_11 = arith.constant 0.000000e+00 : f32
    %15 = vector.broadcast %cst_11 : f32 to vector<16x576xf32>
    %16 = arith.maximumf %14, %15 : vector<16x576xf32>
    %17 = arith.truncf %16 : vector<16x576xf32> to vector<16x576xbf16>
    %c0_12 = arith.constant 0 : index
    %c0_13 = arith.constant 0 : index
    %18 = vector.load %arg6[%c0_12, %c0_13] : memref<576x256xbf16, #tpu.memory_space<vmem>>, vector<576x256xbf16>
    %cst_14 = arith.constant dense<0.000000e+00> : vector<16x256xf32>
    %19 = tpu.matmul %17, %18, %cst_14 {dimension_numbers = #tpu.dot_dimension_numbers<[1], [0], [0], [1], [0, 0, 1, 1], [], []>} : vector<16x576xbf16>, vector<576x256xbf16>, vector<16x256xf32> -> vector<16x256xf32>
    %c0_15 = arith.constant 0 : index
    %c0_16 = arith.constant 0 : index
    %20 = vector.load %arg7[%c0_15, %c0_16] : memref<1x256xf32, #tpu.memory_space<vmem>>, vector<1x256xf32>
    %21 = vector.broadcast %20 : vector<1x256xf32> to vector<16x256xf32>
    %22 = arith.addf %19, %21 : vector<16x256xf32>
    %cst_17 = arith.constant 0.000000e+00 : f32
    %23 = vector.broadcast %cst_17 : f32 to vector<16x256xf32>
    %24 = arith.maximumf %22, %23 : vector<16x256xf32>
    %25 = arith.truncf %24 : vector<16x256xf32> to vector<16x256xbf16>
    %c0_18 = arith.constant 0 : index
    %c0_19 = arith.constant 0 : index
    %26 = vector.load %arg8[%c0_18, %c0_19] : memref<256x32xbf16, #tpu.memory_space<vmem>>, vector<256x32xbf16>
    %cst_20 = arith.constant dense<0.000000e+00> : vector<16x32xf32>
    %27 = tpu.matmul %25, %26, %cst_20 {dimension_numbers = #tpu.dot_dimension_numbers<[1], [0], [0], [1], [0, 0, 1, 1], [], []>} : vector<16x256xbf16>, vector<256x32xbf16>, vector<16x32xf32> -> vector<16x32xf32>
    %c0_21 = arith.constant 0 : index
    %c0_22 = arith.constant 0 : index
    %28 = vector.load %arg9[%c0_21, %c0_22] : memref<1x32xf32, #tpu.memory_space<vmem>>, vector<1x32xf32>
    %29 = vector.broadcast %28 : vector<1x32xf32> to vector<16x32xf32>
    %30 = arith.addf %27, %29 : vector<16x32xf32>
    %cst_23 = arith.constant 0.000000e+00 : f32
    %31 = vector.broadcast %cst_23 : f32 to vector<16x32xf32>
    %32 = arith.maximumf %30, %31 : vector<16x32xf32>
    %33 = arith.truncf %32 : vector<16x32xf32> to vector<16x32xbf16>
    %c0_24 = arith.constant 0 : index
    %c0_25 = arith.constant 0 : index
    %34 = vector.load %arg10[%c0_24, %c0_25] : memref<32x128xbf16, #tpu.memory_space<vmem>>, vector<32x128xbf16>
    %cst_26 = arith.constant dense<0.000000e+00> : vector<16x128xf32>
    %35 = tpu.matmul %33, %34, %cst_26 {dimension_numbers = #tpu.dot_dimension_numbers<[1], [0], [0], [1], [0, 0, 1, 1], [], []>} : vector<16x32xbf16>, vector<32x128xbf16>, vector<16x128xf32> -> vector<16x128xf32>
    %c0_27 = arith.constant 0 : index
    %c0_28 = arith.constant 0 : index
    %36 = vector.load %arg11[%c0_27, %c0_28] : memref<1x128xf32, #tpu.memory_space<vmem>>, vector<1x128xf32>
    %37 = vector.broadcast %36 : vector<1x128xf32> to vector<16x128xf32>
    %38 = arith.addf %35, %37 : vector<16x128xf32>
    %c0_29 = arith.constant 0 : index
    %c0_30 = arith.constant 0 : index
    %39 = vector.load %arg12[%c0_29, %c0_30] : memref<16x128xf32, #tpu.memory_space<vmem>>, vector<16x128xf32>
    tpu.vector_store %arg12[%c0_29, %c0_30], %38 {strides = array<i32>} : memref<16x128xf32, #tpu.memory_space<vmem>>, vector<16x128xf32>,
    return
  }
  func.func @transform_0(%arg0: i32) -> (i32, i32) {
    %c0_i32 = arith.constant 0 : i32
    %c0_i32_0 = arith.constant 0 : i32
    return %arg0, %c0_i32 : i32, i32
  }
  func.func @transform_1(%arg0: i32) -> (i32, i32) {
    %c0_i32 = arith.constant 0 : i32
    %c0_i32_0 = arith.constant 0 : i32
    %c0_i32_1 = arith.constant 0 : i32
    return %c0_i32, %c0_i32_0 : i32, i32
  }
  func.func @transform_2(%arg0: i32) -> (i32, i32) {
    %c0_i32 = arith.constant 0 : i32
    %c0_i32_0 = arith.constant 0 : i32
    %c0_i32_1 = arith.constant 0 : i32
    return %c0_i32, %c0_i32_0 : i32, i32
  }
  func.func @transform_3(%arg0: i32) -> (i32, i32) {
    %c0_i32 = arith.constant 0 : i32
    %c0_i32_0 = arith.constant 0 : i32
    %c0_i32_1 = arith.constant 0 : i32
    return %c0_i32, %c0_i32_0 : i32, i32
  }
  func.func @transform_4(%arg0: i32) -> (i32, i32) {
    %c0_i32 = arith.constant 0 : i32
    %c0_i32_0 = arith.constant 0 : i32
    %c0_i32_1 = arith.constant 0 : i32
    return %c0_i32, %c0_i32_0 : i32, i32
  }
  func.func @transform_5(%arg0: i32) -> (i32, i32) {
    %c0_i32 = arith.constant 0 : i32
    %c0_i32_0 = arith.constant 0 : i32
    %c0_i32_1 = arith.constant 0 : i32
    return %c0_i32, %c0_i32_0 : i32, i32
  }
  func.func @transform_6(%arg0: i32) -> (i32, i32) {
    %c0_i32 = arith.constant 0 : i32
    %c0_i32_0 = arith.constant 0 : i32
    %c0_i32_1 = arith.constant 0 : i32
    return %c0_i32, %c0_i32_0 : i32, i32
  }
  func.func @transform_7(%arg0: i32) -> (i32, i32) {
    %c0_i32 = arith.constant 0 : i32
    %c0_i32_0 = arith.constant 0 : i32
    %c0_i32_1 = arith.constant 0 : i32
    return %c0_i32, %c0_i32_0 : i32, i32
  }
  func.func @transform_8(%arg0: i32) -> (i32, i32) {
    %c0_i32 = arith.constant 0 : i32
    %c0_i32_0 = arith.constant 0 : i32
    %c0_i32_1 = arith.constant 0 : i32
    return %c0_i32, %c0_i32_0 : i32, i32
  }
  func.func @transform_9(%arg0: i32) -> (i32, i32) {
    %c0_i32 = arith.constant 0 : i32
    %c0_i32_0 = arith.constant 0 : i32
    %c0_i32_1 = arith.constant 0 : i32
    return %c0_i32, %c0_i32_0 : i32, i32
  }
  func.func @transform_10(%arg0: i32) -> (i32, i32) {
    %c0_i32 = arith.constant 0 : i32
    %c0_i32_0 = arith.constant 0 : i32
    %c0_i32_1 = arith.constant 0 : i32
    return %c0_i32, %c0_i32_0 : i32, i32
  }
  func.func @transform_11(%arg0: i32) -> (i32, i32) {
    %c0_i32 = arith.constant 0 : i32
    %c0_i32_0 = arith.constant 0 : i32
    return %arg0, %c0_i32 : i32, i32
  }
}

</mosaic_0001>

<bundles_post_ra>
// kernel: ff_policy_forward.1
= control target key start
LH: loop header
LB: loop body
LE: loop exit
PB: predicated region body
PF: predicated region fallthrough
CT: control target
= control target key end

     0   :  { %v5283_v3 = vmov 0   ;;  %vm400_vm0 = vcmask 1041408   ;;  %vm396_vm1 = vcmask 818176   ;;  %vm3663_vm2 = vcmask 523264   ;;  %s6895_s1 = inlined_call_operand.vmem [shape: bf16[100,1024], index: 1, kind: input, shape index: {}]   ;;  %s6896_s3 = inlined_call_operand.vmem [shape: bf16[1024,576], index: 3, kind: input, shape index: {}]   ;;  %s6897_s0 = inlined_call_operand.vmem [shape: f32[16,100], index: 0, kind: input, shape index: {}]   ;;  %s6898_s2 = inlined_call_operand.vmem [shape: f32[1,1024], index: 2, kind: input, shape index: {}]   ;;  %s6899_s5 = inlined_call_operand.vmem [shape: bf16[576,256], index: 5, kind: input, shape index: {}]   ;;  %s6900_s4 = inlined_call_operand.vmem [shape: f32[1,576], index: 4, kind: input, shape index: {}]   ;;  %s6901_s7 = inlined_call_operand.vmem [shape: bf16[256,32], index: 7, kind: input, shape index: {}]   ;;  %s6902_s6 = inlined_call_operand.vmem [shape: f32[1,256], index: 6, kind: input, shape index: {}]   ;;  %s6903_s9 = inlined_call_operand.vmem [shape: bf16[32,128], index: 9, kind: input, shape index: {}]   ;;  %s6904_s8 = inlined_call_operand.vmem [shape: f32[1,32], index: 8, kind: input, shape index: {}]   ;;  %s6905_s10 = inlined_call_operand.vmem [shape: f32[1,128], index: 10, kind: input, shape index: {}]   ;;  %s6906_s11 = inlined_call_operand.vmem [shape: f32[16,128], index: 11, kind: output, shape index: {}]  }
   0x1   :  { %v42_v0 = vld [vmem:[%s6895_s1] sm:$0xff]  ;;  %v43_v2 = vld [vmem:[%s6895_s1 + $0x8] sm:$0xff]  ;;  %457 = vmatprep.mubr.bf16.mxu0 %v5283_v3  ;;  %500 = vmatprep.mubr.bf16.mxu1 %v5283_v3  ;;  %v44_v53 = vld [vmem:[%s6895_s1 + $0x10] sm:$0xff]  ;;  %vm5285_vm3 = vmmov 0   ;;  %vm4004_vm4 = vcmask 261120  }
   0x2   :  { %v46_v1 = vld [vmem:[%s6895_s1 + $0x20] sm:$0xff]  ;;  %v47_v5 = vld [vmem:[%s6895_s1 + $0x28] sm:$0xff]  ;;  %v48_v54 = vld [vmem:[%s6895_s1 + $0x30] sm:$0xff] }
   0x3   :  { %v4056_v4 = vcombine.high %v42_v0, %v46_v1  ;;  %v4055_v6 = vcombine.low %v42_v0, %v46_v1  ;;  %v50_v7 = vld [vmem:[%s6895_s1 + $0x40] sm:$0xff]  ;;  %v4058_v9 = vcombine.high %v43_v2, %v47_v5  ;;  %v4057_v10 = vcombine.low %v43_v2, %v47_v5  ;;  %v51_v12 = vld [vmem:[%s6895_s1 + $0x48] sm:$0xff]  ;;  %v45_v57 = vld [vmem:[%s6895_s1 + $0x18] sm:$0xff] }
   0x4   :  { %v54_v8 = vld [vmem:[%s6895_s1 + $0x60] sm:$0xff]  ;;  %v55_v13 = vld [vmem:[%s6895_s1 + $0x68] sm:$0xff]  ;;  %v49_v58 = vld [vmem:[%s6895_s1 + $0x38] sm:$0xff]  ;;  %v4060_v62 = vcombine.high %v44_v53, %v48_v54  ;;  %v4059_v5 = vcombine.low %v44_v53, %v48_v54 }
   0x5   :  { %v4064_v11 = vcombine.high %v50_v7, %v54_v8  ;;  %v58_v14 = vld [vmem:[%s6895_s1 + $0x80] sm:$0xff]  ;;  %425 = vmatprep.subr.bf16.mxu0 %v4056_v4  ;;  %v4066_v15 = vcombine.high %v51_v12, %v55_v13  ;;  %v59_v17 = vld [vmem:[%s6895_s1 + $0x88] sm:$0xff]  ;;  %468 = vmatprep.subr.bf16.mxu1 %v4058_v9  ;;  %v4063_v19 = vcombine.low %v50_v7, %v54_v8  ;;  %v52_v63 = vld [vmem:[%s6895_s1 + $0x50] sm:$0xff] }
   0x6   :  { %v62_v16 = vld [vmem:[%s6895_s1 + $0xa0] sm:$0xff]  ;;  %v63_v18 = vld [vmem:[%s6895_s1 + $0xa8] sm:$0xff]  ;;  %426 = vmatpush1.bf16.msra.mxu0 %v4055_v6  ;;  %469 = vmatpush1.bf16.msra.mxu1 %v4057_v10  ;;  %v4065_v20 = vcombine.low %v51_v12, %v55_v13  ;;  %v56_v1 = vld [vmem:[%s6895_s1 + $0x70] sm:$0xff]  ;;  %v4062_v2 = vcombine.high %v45_v57, %v49_v58 }
   0x7   :  { %427 = vmatprep.subr.bf16.mxu0 %v4064_v11  ;;  %v4072_v21 = vcombine.high %v58_v14, %v62_v16  ;;  %470 = vmatprep.subr.bf16.mxu1 %v4066_v15  ;;  %v4074_v22 = vcombine.high %v59_v17, %v63_v18  ;;  %v66_v23 = vld [vmem:[%s6895_s1 + $0xc0] sm:$0xff]  ;;  %v67_v25 = vld [vmem:[%s6895_s1 + $0xc8] sm:$0xff]  ;;  %v4071_v27 = vcombine.low %v58_v14, %v62_v16  ;;  %v53_v6 = vld [vmem:[%s6895_s1 + $0x58] sm:$0xff] }
   0x8   :  { %v70_v24 = vld [vmem:[%s6895_s1 + $0xe0] sm:$0xff]  ;;  %v71_v26 = vld [vmem:[%s6895_s1 + $0xe8] sm:$0xff]  ;;  %v4073_v28 = vcombine.low %v59_v17, %v63_v18  ;;  %v57_v7 = vld [vmem:[%s6895_s1 + $0x78] sm:$0xff]  ;;  %v4068_v8 = vcombine.high %v52_v63, %v56_v1  ;;  %v4061_v11 = vcombine.low %v45_v57, %v49_v58  ;;  %v4067_v13 = vcombine.low %v52_v63, %v56_v1 }
   0x9   :  { %v4080_v29 = vcombine.high %v66_v23, %v70_v24  ;;  %v4082_v30 = vcombine.high %v67_v25, %v71_v26  ;;  %v74_v31 = vld [vmem:[%s6895_s1 + $0x100] sm:$0xff]  ;;  %v75_v33 = vld [vmem:[%s6895_s1 + $0x108] sm:$0xff]  ;;  %v4079_v35 = vcombine.low %v66_v23, %v70_v24  ;;  %v4081_v36 = vcombine.low %v67_v25, %v71_v26  ;;  %v60_v9 = vld [vmem:[%s6895_s1 + $0x90] sm:$0xff] }
   0xa   :  { %428 = vmatpush1.bf16.msra.mxu0 %v4063_v19  ;;  %471 = vmatpush1.bf16.msra.mxu1 %v4065_v20  ;;  %v78_v32 = vld [vmem:[%s6895_s1 + $0x120] sm:$0xff]  ;;  %v79_v34 = vld [vmem:[%s6895_s1 + $0x128] sm:$0xff]  ;;  %v64_v10 = vld [vmem:[%s6895_s1 + $0xb0] sm:$0xff]  ;;  %v4070_v12 = vcombine.high %v53_v6, %v57_v7  ;;  %v4069_v19 = vcombine.low %v53_v6, %v57_v7 }
   0xb   :  { %429 = vmatprep.subr.bf16.mxu0 %v4072_v21  ;;  %472 = vmatprep.subr.bf16.mxu1 %v4074_v22  ;;  %v4088_v37 = vcombine.high %v74_v31, %v78_v32  ;;  %v4090_v38 = vcombine.high %v75_v33, %v79_v34  ;;  %v82_v39 = vld [vmem:[%s6895_s1 + $0x140] sm:$0xff]  ;;  %v83_v41 = vld [vmem:[%s6895_s1 + $0x148] sm:$0xff]  ;;  %v4087_v43 = vcombine.low %v74_v31, %v78_v32  ;;  %v61_v14 = vld [vmem:[%s6895_s1 + $0x98] sm:$0xff] }
   0xc   :  { %v86_v40 = vld [vmem:[%s6895_s1 + $0x160] sm:$0xff]  ;;  %v87_v42 = vld [vmem:[%s6895_s1 + $0x168] sm:$0xff]  ;;  %v4089_v44 = vcombine.low %v75_v33, %v79_v34  ;;  %v65_v15 = vld [vmem:[%s6895_s1 + $0xb8] sm:$0xff]  ;;  %v4076_v16 = vcombine.high %v60_v9, %v64_v10  ;;  %v4075_v21 = vcombine.low %v60_v9, %v64_v10 }
   0xd   :  { %v4096_v45 = vcombine.high %v82_v39, %v86_v40  ;;  %v4098_v46 = vcombine.high %v83_v41, %v87_v42  ;;  %v90_v47 = vld [vmem:[%s6895_s1 + $0x180] sm:$0x33]  ;;  %v91_v48 = vld [vmem:[%s6895_s1 + $0x188] sm:$0x33]  ;;  %v4095_v49 = vcombine.low %v82_v39, %v86_v40  ;;  %v4097_v50 = vcombine.low %v83_v41, %v87_v42  ;;  %v68_v17 = vld [vmem:[%s6895_s1 + $0xd0] sm:$0xff] }
   0xe   :  { %430 = vmatpush1.bf16.msra.mxu0 %v4071_v27  ;;  %473 = vmatpush1.bf16.msra.mxu1 %v4073_v28  ;;  %v4104_v51 = vcombine.high %v90_v47, %v90_v47  ;;  %v4103_v52 = vcombine.low %v90_v47, %v90_v47  ;;  %v4106_v55 = vcombine.high %v91_v48, %v91_v48  ;;  %v39_v59 = vld [vmem:[%s6897_s0] sm:$0xff]  ;;  %v40_v60 = vld [vmem:[%s6897_s0 + $0x8] sm:$0xff]  ;;  %v72_v18 = vld [vmem:[%s6895_s1 + $0xf0] sm:$0xff] }
   0xf   :  { %431 = vmatprep.subr.bf16.mxu0 %v4080_v29  ;;  %474 = vmatprep.subr.bf16.mxu1 %v4082_v30  ;;  %v4105_v56 = vcombine.low %v91_v48, %v91_v48  ;;  %v5454_v4 = vpack.c.bf16 %v40_v60, %v39_v59  ;;  %v4078_v20 = vcombine.high %v61_v14, %v65_v15  ;;  %v69_v22 = vld [vmem:[%s6895_s1 + $0xd8] sm:$0xff]  ;;  %v76_v25 = vld [vmem:[%s6895_s1 + $0x110] sm:$0xff]  ;;  %v4717_v58 = vld [vmem:[%s6896_s3 + $0x2c] ss:$20 sps:$4 sm:$0xff]  }
  0x10   :  { %v402_v61 = vsel %vm400_vm0, %v4103_v52, 0  ;;  %v73_v23 = vld [vmem:[%s6895_s1 + $0xf8] sm:$0xff]  ;;  %v4084_v24 = vcombine.high %v68_v17, %v72_v18  ;;  %v80_v26 = vld [vmem:[%s6895_s1 + $0x130] sm:$0xff]  ;;  %v4077_v27 = vcombine.low %v61_v14, %v65_v15  ;;  %v4083_v29 = vcombine.low %v68_v17, %v72_v18  ;;  %v4744_v9 = vld [vmem:[%s6896_s3 + $0x34c] ss:$20 sps:$4 sm:$0xff]  }
  0x11   :  { %v408_v0 = vsel %vm400_vm0, %v4105_v56, 0  ;;  %v4086_v28 = vcombine.high %v69_v22, %v73_v23  ;;  %v77_v30 = vld [vmem:[%s6895_s1 + $0x118] sm:$0xff]  ;;  %v4092_v32 = vcombine.high %v76_v25, %v80_v26  ;;  %v84_v33 = vld [vmem:[%s6895_s1 + $0x150] sm:$0xff]  ;;  %v4720_v56 = vld [vmem:[%s6896_s3 + $0x2ac] ss:$20 sps:$4 sm:$0xff]  }
  0x12   :  { %432 = vmatpush1.bf16.msra.mxu0 %v4079_v35  ;;  %475 = vmatpush1.bf16.msra.mxu1 %v4081_v36  ;;  %v81_v31 = vld [vmem:[%s6895_s1 + $0x138] sm:$0xff]  ;;  %v88_v34 = vld [vmem:[%s6895_s1 + $0x170] sm:$0xff]  ;;  %v4085_v35 = vcombine.low %v69_v22, %v73_v23 }
  0x13   :  { %433 = vmatprep.subr.bf16.mxu0 %v4088_v37  ;;  %476 = vmatprep.subr.bf16.mxu1 %v4090_v38  ;;  %v4094_v36 = vcombine.high %v77_v30, %v81_v31  ;;  %v4091_v37 = vcombine.low %v76_v25, %v80_v26  ;;  %v85_v38 = vld [vmem:[%s6895_s1 + $0x158] sm:$0xff]  ;;  %v4100_v40 = vcombine.high %v84_v33, %v88_v34  ;;  %v92_v41 = vld [vmem:[%s6895_s1 + $0x190] sm:$0x33]  ;;  %v4768_v25 = vld [vmem:[%s6896_s3 + $0x3ec] ss:$20 sps:$4 sm:$0xff]  }
  0x14   :  { %v89_v39 = vld [vmem:[%s6895_s1 + $0x178] sm:$0xff]  ;;  %v4093_v42 = vcombine.low %v77_v30, %v81_v31  ;;  %v4107_v47 = vcombine.low %v92_v41, %v92_v41  ;;  %v4709_v57 = vld [vmem:[%s6896_s3] ss:$20 sps:$4 sm:$0xff]   ;;  %v4724_v63 = vld [vmem:[%s6896_s3 + $0x2d0] ss:$20 sps:$4 sm:$0xff]  }
  0x15   :  { %v4101_v48 = vcombine.low %v85_v38, %v89_v39  ;;  %v4714_v52 = vld [vmem:[%s6896_s3 + $0x284] ss:$20 sps:$4 sm:$0xff]   ;;  %v4718_v59 = vld [vmem:[%s6896_s3 + $0x2a8] ss:$20 sps:$4 sm:$0xff]   ;;  %v4733_v10 = vld [vmem:[%s6896_s3 + $0xa0] ss:$20 sps:$4 sm:$0xff]  }
  0x16   :  { %434 = vmatpush1.bf16.msra.mxu0 %v4087_v43  ;;  %477 = vmatpush1.bf16.msra.mxu1 %v4089_v44  ;;  %v4102_v43 = vcombine.high %v85_v38, %v89_v39  ;;  %v4099_v44 = vcombine.low %v84_v33, %v88_v34  ;;  %v4711_v53 = vld [vmem:[%s6896_s3 + $0x4] ss:$20 sps:$4 sm:$0xff]   ;;  %v4726_v60 = vld [vmem:[%s6896_s3 + $0x2d4] ss:$20 sps:$4 sm:$0xff]   ;;  %v4756_v17 = vld [vmem:[%s6896_s3 + $0x39c] ss:$20 sps:$4 sm:$0xff]  }
  0x17   :  { %435 = vmatprep.subr.bf16.mxu0 %v4096_v45  ;;  %478 = vmatprep.subr.bf16.mxu1 %v4098_v46  ;;  %v93_v45 = vld [vmem:[%s6895_s1 + $0x198] sm:$0x33]  ;;  %v4108_v46 = vcombine.high %v92_v41, %v92_v41  ;;  %v4721_v1 = vld [vmem:[%s6896_s3 + $0x50] ss:$20 sps:$4 sm:$0xff]   ;;  %v4747_v15 = vld [vmem:[%s6896_s3 + $0xf4] ss:$20 sps:$4 sm:$0xff]  }
  0x18   :  { %v4727_v6 = vld [vmem:[%s6896_s3 + $0x78] ss:$20 sps:$4 sm:$0xff]   ;;  %v4739_v14 = vld [vmem:[%s6896_s3 + $0xc8] ss:$20 sps:$4 sm:$0xff]   ;;  %v4745_v18 = vld [vmem:[%s6896_s3 + $0xf0] ss:$20 sps:$4 sm:$0xff]  }
  0x19   :  { %v4735_v7 = vld [vmem:[%s6896_s3 + $0xa4] ss:$20 sps:$4 sm:$0xff]   ;;  %v4757_v26 = vld [vmem:[%s6896_s3 + $0x140] ss:$20 sps:$4 sm:$0xff]   ;;  %v4763_v30 = vld [vmem:[%s6896_s3 + $0x168] ss:$20 sps:$4 sm:$0xff]  }
  0x1a   :  { %436 = vmatpush1.bf16.msra.mxu0 %v4095_v49  ;;  %479 = vmatpush1.bf16.msra.mxu1 %v4097_v50  ;;  %v4110_v49 = vcombine.high %v93_v45, %v93_v45  ;;  %v4109_v50 = vcombine.low %v93_v45, %v93_v45  ;;  %v4751_v22 = vld [vmem:[%s6896_s3 + $0x118] ss:$20 sps:$4 sm:$0xff]   ;;  %v4771_v31 = vld [vmem:[%s6896_s3 + $0x194] ss:$20 sps:$4 sm:$0xff]   ;;  %v4780_v33 = vld [vmem:[%s6896_s3 + $0x43c] ss:$20 sps:$4 sm:$0xff]  }
  0x1b   :  { %4111 = vmatprep.subr.msk.bf16.mxu0 %vm400_vm0, %v4104_v51  ;;  %4113 = vmatprep.subr.msk.bf16.mxu1 %vm400_vm0, %v4106_v55  ;;  %v414_v51 = vsel %vm400_vm0, %v4107_v47, 0  ;;  %v4712_v55 = vld [vmem:[%s6896_s3 + $0x280] ss:$20 sps:$4 sm:$0xff]   ;;  %v4759_v23 = vld [vmem:[%s6896_s3 + $0x144] ss:$20 sps:$4 sm:$0xff]  }
  0x1c   :  { %v420_v54 = vsel %vm400_vm0, %v4109_v50, 0  ;;  %v4769_v34 = vld [vmem:[%s6896_s3 + $0x190] ss:$20 sps:$4 sm:$0xff]   ;;  %v4775_v38 = vld [vmem:[%s6896_s3 + $0x1b8] ss:$20 sps:$4 sm:$0xff]  }
  0x1d   :  { %v4783_v39 = vld [vmem:[%s6896_s3 + $0x1e4] ss:$20 sps:$4 sm:$0xff]   ;;  %v4792_v41 = vld [vmem:[%s6896_s3 + $0x48c] ss:$20 sps:$4 sm:$0xff]   ;;  %v4787_v45 = vld [vmem:[%s6896_s3 + $0x208] ss:$20 sps:$4 sm:$0xff]  }
  0x1e   :  { %438 = vmatpush1.bf16.msra.mxu0 %v402_v61  ;;  %481 = vmatpush1.bf16.msra.mxu1 %v408_v0  ;;  %v4715_v61 = vld [vmem:[%s6896_s3 + $0x28] ss:$20 sps:$4 sm:$0xff]  }
  0x1f   :  { %511 = vmatprep.subr.bf16.mxu0 %v4060_v62  ;;  %554 = vmatprep.subr.bf16.mxu1 %v4062_v2  ;;  %v4723_v62 = vld [vmem:[%s6896_s3 + $0x54] ss:$20 sps:$4 sm:$0xff]   ;;  %v4732_v0 = vld [vmem:[%s6896_s3 + $0x2fc] ss:$20 sps:$4 sm:$0xff]  }
  0x20   :  { %v4729_v2 = vld [vmem:[%s6896_s3 + $0x7c] ss:$20 sps:$4 sm:$0xff]   ;;  %v4798_v47 = vld [vmem:[%s6896_s3 + $0x4b4] ss:$20 sps:$4 sm:$0xff]  }
  0x21   :  { %4112 = vmatmul.mubr.msk.bf16.vlgmr.msra.gmra.mrb[0].mxu0 %vm396_vm1, %v5454_v4  ;;  %4114 = vmatmul.mubr.msk.bf16.vlgmr.msra.gmra.mrb[0].mxu1 %vm396_vm1, %v5454_v4  ;;  %v4801_v50 = vld [vmem:[%s6896_s3 + $0x25c] ss:$20 sps:$4 sm:$0xff]  }
  0x22   :  { %512 = vmatpush1.bf16.msra.mxu0 %v4059_v5  ;;  %543 = vmatprep.mubr.bf16.mxu0 %v5283_v3  ;;  %v4738_v5 = vld [vmem:[%s6896_s3 + $0x324] ss:$20 sps:$4 sm:$0xff]  }
  0x23   :  { %513 = vmatprep.subr.bf16.mxu0 %v4068_v8  ;;  %555 = vmatpush1.bf16.msra.mxu1 %v4061_v11  ;;  %v4736_v8 = vld [vmem:[%s6896_s3 + $0x320] ss:$20 sps:$4 sm:$0xff]  }
  0x24   :  { %586 = vmatprep.mubr.bf16.mxu1 %v5283_v3  ;;  %556 = vmatprep.subr.bf16.mxu1 %v4070_v12  ;;  %v4741_v11 = vld [vmem:[%s6896_s3 + $0xcc] ss:$20 sps:$4 sm:$0xff]   ;;  %v4742_v12 = vld [vmem:[%s6896_s3 + $0x348] ss:$20 sps:$4 sm:$0xff]  }
  0x26   :  { %514 = vmatpush1.bf16.msra.mxu0 %v4067_v13  ;;  %v4750_v13 = vld [vmem:[%s6896_s3 + $0x374] ss:$20 sps:$4 sm:$0xff]  }
  0x27   :  { %515 = vmatprep.subr.bf16.mxu0 %v4076_v16  ;;  %557 = vmatpush1.bf16.msra.mxu1 %v4069_v19  ;;  %v4748_v16 = vld [vmem:[%s6896_s3 + $0x370] ss:$20 sps:$4 sm:$0xff]  }
  0x28   :  { %558 = vmatprep.subr.bf16.mxu1 %v4078_v20  ;;  %v4753_v19 = vld [vmem:[%s6896_s3 + $0x11c] ss:$20 sps:$4 sm:$0xff]   ;;  %v4754_v20 = vld [vmem:[%s6896_s3 + $0x398] ss:$20 sps:$4 sm:$0xff]  }
  0x2a   :  { %516 = vmatpush1.bf16.msra.mxu0 %v4075_v21  ;;  %v4762_v21 = vld [vmem:[%s6896_s3 + $0x3c4] ss:$20 sps:$4 sm:$0xff]  }
  0x2b   :  { %517 = vmatprep.subr.bf16.mxu0 %v4084_v24  ;;  %559 = vmatpush1.bf16.msra.mxu1 %v4077_v27  ;;  %v4760_v24 = vld [vmem:[%s6896_s3 + $0x3c0] ss:$20 sps:$4 sm:$0xff]  }
  0x2c   :  { %560 = vmatprep.subr.bf16.mxu1 %v4086_v28  ;;  %v4765_v27 = vld [vmem:[%s6896_s3 + $0x16c] ss:$20 sps:$4 sm:$0xff]   ;;  %v4766_v28 = vld [vmem:[%s6896_s3 + $0x3e8] ss:$20 sps:$4 sm:$0xff]  }
  0x2e   :  { %518 = vmatpush1.bf16.msra.mxu0 %v4083_v29  ;;  %v4774_v29 = vld [vmem:[%s6896_s3 + $0x414] ss:$20 sps:$4 sm:$0xff]  }
  0x2f   :  { %519 = vmatprep.subr.bf16.mxu0 %v4092_v32  ;;  %561 = vmatpush1.bf16.msra.mxu1 %v4085_v35  ;;  %v4772_v32 = vld [vmem:[%s6896_s3 + $0x410] ss:$20 sps:$4 sm:$0xff]  }
  0x30   :  { %562 = vmatprep.subr.bf16.mxu1 %v4094_v36  ;;  %v4777_v35 = vld [vmem:[%s6896_s3 + $0x1bc] ss:$20 sps:$4 sm:$0xff]   ;;  %v4778_v36 = vld [vmem:[%s6896_s3 + $0x438] ss:$20 sps:$4 sm:$0xff]  }
  0x32   :  { %520 = vmatpush1.bf16.msra.mxu0 %v4091_v37  ;;  %v4786_v37 = vld [vmem:[%s6896_s3 + $0x464] ss:$20 sps:$4 sm:$0xff]  }
  0x33   :  { %521 = vmatprep.subr.bf16.mxu0 %v4100_v40  ;;  %563 = vmatpush1.bf16.msra.mxu1 %v4093_v42  ;;  %v4784_v40 = vld [vmem:[%s6896_s3 + $0x460] ss:$20 sps:$4 sm:$0xff]  }
  0x34   :  { %564 = vmatprep.subr.bf16.mxu1 %v4102_v43  ;;  %v4781_v42 = vld [vmem:[%s6896_s3 + $0x1e0] ss:$20 sps:$4 sm:$0xff]  }
  0x35   :  { %v4789_v43 = vld [vmem:[%s6896_s3 + $0x20c] ss:$20 sps:$4 sm:$0xff]  }
  0x36   :  { %522 = vmatpush1.bf16.msra.mxu0 %v4099_v44  ;;  %v4790_v44 = vld [vmem:[%s6896_s3 + $0x488] ss:$20 sps:$4 sm:$0xff]  }
  0x37   :  { %4115 = vmatprep.subr.msk.bf16.mxu0 %vm400_vm0, %v4108_v46  ;;  %565 = vmatpush1.bf16.msra.mxu1 %v4101_v48  ;;  %v4795_v46 = vld [vmem:[%s6896_s3 + $0x234] ss:$20 sps:$4 sm:$0xff]   ;;  %v4793_v48 = vld [vmem:[%s6896_s3 + $0x230] ss:$20 sps:$4 sm:$0xff]  }
  0x38   :  { %4117 = vmatprep.subr.msk.bf16.mxu1 %vm400_vm0, %v4110_v49  ;;  %v4796_v49 = vld [vmem:[%s6896_s3 + $0x4b0] ss:$20 sps:$4 sm:$0xff]  }
  0x3a   :  { %524 = vmatpush1.bf16.msra.mxu0 %v414_v51  ;;  %v4804_v51 = vld [vmem:[%s6896_s3 + $0x4dc] ss:$20 sps:$4 sm:$0xff]  }
  0x3b   :  { %2739 = vmatprep.subr.bf16.mxu0 %v4714_v52  ;;  %567 = vmatpush1.bf16.msra.mxu1 %v420_v54  ;;  %v4799_v52 = vld [vmem:[%s6896_s3 + $0x258] ss:$20 sps:$4 sm:$0xff]  }
  0x3c   :  { %2696 = vmatprep.subr.bf16.mxu1 %v4711_v53  ;;  %v4802_v53 = vld [vmem:[%s6896_s3 + $0x4d8] ss:$20 sps:$4 sm:$0xff]  }
  0x3d   :  { %4116 = vmatmul.mubr.msk.bf16.vlgmr.msra.gmra.mrb[4].mxu0 %vm396_vm1, %v5454_v4  ;;  %v4807_v54 = vld [vmem:[%s6896_s3 + $0x504] ss:$20 sps:$4 sm:$0xff]  }
  0x3e   :  { %2740 = vmatpush1.bf16.msra.mxu0 %v4712_v55  ;;  %4118 = vmatmul.mubr.msk.bf16.vlgmr.msra.gmra.mrb[4].mxu1 %vm396_vm1, %v5454_v4  ;;  %v4730_v4 = vld [vmem:[%s6896_s3 + $0x2f8] ss:$20 sps:$4 sm:$0xff]  }
  0x3f   :  { %2741 = vmatprep.subr.bf16.mxu0 %v4720_v56  ;;  %2697 = vmatpush1.bf16.msra.mxu1 %v4709_v57  ;;  %v4810_v55 = vld [vmem:[%s6896_s3 + $0xc] ss:$20 sps:$4 sm:$0xff]   ;;  %v96_v56 = vlaneseq }
  0x40   :  { %2698 = vmatprep.subr.bf16.mxu1 %v4717_v58 }
  0x41   :  { %v5728_v57 = vshrl.u32 %v96_v56, 7  ;;  %v4837_v56 = vld [vmem:[%s6896_s3 + $0x5cc] ss:$20 sps:$4 sm:$0xff]  }
  0x42   :  { %2742 = vmatpush1.bf16.msra.mxu0 %v4718_v59  ;;  %v5736_v59 = vld [vmem:[%s6898_s2] sm:$0xff] }
  0x43   :  { %2743 = vmatprep.subr.bf16.mxu0 %v4726_v60  ;;  %2699 = vmatpush1.bf16.msra.mxu1 %v4715_v61  ;;  %v5731_v58 = vsub.s32 0, %v5728_v57  ;;  %v106_v60 = vsub.s32 2, %v5728_v57  ;;  %v5740_v61 = vsub.s32 1, %v5728_v57 }
  0x44   :  { %2700 = vmatprep.subr.bf16.mxu1 %v4723_v62  ;;  %v110_v62 = vsub.s32 3, %v5728_v57 }
  0x46   :  { %2744 = vmatpush1.bf16.msra.mxu0 %v4724_v63  ;;  %v99_v63 = vrot.slane %v5736_v59, %v5731_v58 }
  0x47   :  { %2745 = vmatprep.subr.bf16.mxu0 %v4732_v0  ;;  %2701 = vmatpush1.bf16.msra.mxu1 %v4721_v1  ;;  %v107_v0 = vrot.slane %v5736_v59, %v106_v60  ;;  %v103_v1 = vrot.slane %v5736_v59, %v5740_v61 }
  0x48   :  { %2702 = vmatprep.subr.bf16.mxu1 %v4729_v2  ;;  %v111_v2 = vrot.slane %v5736_v59, %v110_v62 }
  0x4a   :  { %2746 = vmatpush1.bf16.msra.mxu0 %v4730_v4 }
  0x4b   :  { %2747 = vmatprep.subr.bf16.mxu0 %v4738_v5  ;;  %2703 = vmatpush1.bf16.msra.mxu1 %v4727_v6 }
  0x4c   :  { %2704 = vmatprep.subr.bf16.mxu1 %v4735_v7 }
  0x4e   :  { %2748 = vmatpush1.bf16.msra.mxu0 %v4736_v8 }
  0x4f   :  { %2749 = vmatprep.subr.bf16.mxu0 %v4744_v9  ;;  %2705 = vmatpush1.bf16.msra.mxu1 %v4733_v10 }
  0x50   :  { %2706 = vmatprep.subr.bf16.mxu1 %v4741_v11 }
  0x52   :  { %2750 = vmatpush1.bf16.msra.mxu0 %v4742_v12 }
  0x53   :  { %2751 = vmatprep.subr.bf16.mxu0 %v4750_v13  ;;  %2707 = vmatpush1.bf16.msra.mxu1 %v4739_v14 }
  0x54   :  { %2708 = vmatprep.subr.bf16.mxu1 %v4747_v15 }
  0x56   :  { %2752 = vmatpush1.bf16.msra.mxu0 %v4748_v16 }
  0x57   :  { %2753 = vmatprep.subr.bf16.mxu0 %v4756_v17  ;;  %2709 = vmatpush1.bf16.msra.mxu1 %v4745_v18 }
  0x58   :  { %2710 = vmatprep.subr.bf16.mxu1 %v4753_v19 }
  0x5a   :  { %2754 = vmatpush1.bf16.msra.mxu0 %v4754_v20 }
  0x5b   :  { %2755 = vmatprep.subr.bf16.mxu0 %v4762_v21  ;;  %2711 = vmatpush1.bf16.msra.mxu1 %v4751_v22 }
  0x5c   :  { %2712 = vmatprep.subr.bf16.mxu1 %v4759_v23 }
  0x5e   :  { %2756 = vmatpush1.bf16.msra.mxu0 %v4760_v24 }
  0x5f   :  { %2757 = vmatprep.subr.bf16.mxu0 %v4768_v25  ;;  %2713 = vmatpush1.bf16.msra.mxu1 %v4757_v26 }
  0x60   :  { %2714 = vmatprep.subr.bf16.mxu1 %v4765_v27 }
  0x62   :  { %2758 = vmatpush1.bf16.msra.mxu0 %v4766_v28 }
  0x63   :  { %2759 = vmatprep.subr.bf16.mxu0 %v4774_v29  ;;  %2715 = vmatpush1.bf16.msra.mxu1 %v4763_v30 }
  0x64   :  { %2716 = vmatprep.subr.bf16.mxu1 %v4771_v31  ;;  %v4808_v31 = vld [vmem:[%s6896_s3 + $0x8] ss:$20 sps:$4 sm:$0xff]  }
  0x66   :  { %2760 = vmatpush1.bf16.msra.mxu0 %v4772_v32 }
  0x67   :  { %2761 = vmatprep.subr.bf16.mxu0 %v4780_v33  ;;  %2717 = vmatpush1.bf16.msra.mxu1 %v4769_v34  ;;  %v4805_v33 = vld [vmem:[%s6896_s3 + $0x500] ss:$20 sps:$4 sm:$0xff]  }
  0x68   :  { %2718 = vmatprep.subr.bf16.mxu1 %v4777_v35  ;;  %v4813_v34 = vld [vmem:[%s6896_s3 + $0x52c] ss:$20 sps:$4 sm:$0xff]   ;;  %v4816_v35 = vld [vmem:[%s6896_s3 + $0x34] ss:$20 sps:$4 sm:$0xff]  }
  0x6a   :  { %2762 = vmatpush1.bf16.msra.mxu0 %v4778_v36  ;;  %v4814_v36 = vld [vmem:[%s6896_s3 + $0x30] ss:$20 sps:$4 sm:$0xff]  }
  0x6b   :  { %2763 = vmatprep.subr.bf16.mxu0 %v4786_v37  ;;  %2719 = vmatpush1.bf16.msra.mxu1 %v4775_v38  ;;  %v4811_v37 = vld [vmem:[%s6896_s3 + $0x528] ss:$20 sps:$4 sm:$0xff]  }
  0x6c   :  { %2720 = vmatprep.subr.bf16.mxu1 %v4783_v39  ;;  %v4822_v38 = vld [vmem:[%s6896_s3 + $0x5c] ss:$20 sps:$4 sm:$0xff]   ;;  %v4819_v39 = vld [vmem:[%s6896_s3 + $0x554] ss:$20 sps:$4 sm:$0xff]  }
  0x6e   :  { %2764 = vmatpush1.bf16.msra.mxu0 %v4784_v40  ;;  %v4820_v40 = vld [vmem:[%s6896_s3 + $0x58] ss:$20 sps:$4 sm:$0xff]  }
  0x6f   :  { %2765 = vmatprep.subr.bf16.mxu0 %v4792_v41  ;;  %2721 = vmatpush1.bf16.msra.mxu1 %v4781_v42  ;;  %v4817_v41 = vld [vmem:[%s6896_s3 + $0x550] ss:$20 sps:$4 sm:$0xff]  }
  0x70   :  { %2722 = vmatprep.subr.bf16.mxu1 %v4789_v43  ;;  %v4828_v42 = vld [vmem:[%s6896_s3 + $0x84] ss:$20 sps:$4 sm:$0xff]   ;;  %v4825_v43 = vld [vmem:[%s6896_s3 + $0x57c] ss:$20 sps:$4 sm:$0xff]  }
  0x72   :  { %2766 = vmatpush1.bf16.msra.mxu0 %v4790_v44  ;;  %v4826_v44 = vld [vmem:[%s6896_s3 + $0x80] ss:$20 sps:$4 sm:$0xff]  }
  0x73   :  { %2723 = vmatpush1.bf16.msra.mxu1 %v4787_v45  ;;  %2767 = vmatprep.subr.bf16.mxu0 %v4798_v47  ;;  %v4823_v45 = vld [vmem:[%s6896_s3 + $0x578] ss:$20 sps:$4 sm:$0xff]   ;;  %v114_v47 = vsub.s32 4, %v5728_v57 }
  0x74   :  { %2724 = vmatprep.subr.bf16.mxu1 %v4795_v46  ;;  %v4834_v46 = vld [vmem:[%s6896_s3 + $0xac] ss:$20 sps:$4 sm:$0xff]  }
  0x76   :  { %2768 = vmatpush1.bf16.msra.mxu0 %v4796_v49  ;;  %v118_v49 = vsub.s32 5, %v5728_v57 }
  0x77   :  { %2725 = vmatpush1.bf16.msra.mxu1 %v4793_v48  ;;  %2769 = vmatprep.subr.bf16.mxu0 %v4804_v51  ;;  %v4831_v48 = vld [vmem:[%s6896_s3 + $0x5a4] ss:$20 sps:$4 sm:$0xff]   ;;  %v4832_v51 = vld [vmem:[%s6896_s3 + $0xa8] ss:$20 sps:$4 sm:$0xff]  }
  0x78   :  { %2726 = vmatprep.subr.bf16.mxu1 %v4801_v50  ;;  %v122_v50 = vsub.s32 6, %v5728_v57 }
  0x7a   :  { %2770 = vmatpush1.bf16.msra.mxu0 %v4802_v53  ;;  %v4829_v53 = vld [vmem:[%s6896_s3 + $0x5a0] ss:$20 sps:$4 sm:$0xff]  }
  0x7b   :  { %2727 = vmatpush1.bf16.msra.mxu1 %v4799_v52  ;;  %2782 = vmatprep.subr.bf16.mxu0 %v4807_v54  ;;  %v126_v52 = vsub.s32 7, %v5728_v57  ;;  %v4840_v54 = vld [vmem:[%s6896_s3 + $0xd4] ss:$20 sps:$4 sm:$0xff]  }
  0x7c   :  { %2868 = vmatprep.subr.bf16.mxu1 %v4810_v55  ;;  %v115_v55 = vrot.slane %v5736_v59, %v114_v47 }
  0xf4   :  { %v459_v4 = vpop.f32.mrb[0].mxu0  ;;  %v502_v6 = vpop.f32.mrb[0].mxu1 }
  0xf5   :  { %v460_v5 = vadd.f32 %v459_v4, %v99_v63  ;;  %v461_v7 = vpop.f32.mrb[1].mxu0  ;;  %v503_v8 = vadd.f32 %v502_v6, %v107_v0  ;;  %v504_v10 = vpop.f32.mrb[1].mxu1  ;;  %v127_v4 = vrot.slane %v5736_v59, %v126_v52  ;;  %v4846_v6 = vld [vmem:[%s6896_s3 + $0xfc] ss:$20 sps:$4 sm:$0xff]  }
  0xf6   :  { %v462_v9 = vadd.f32 %v461_v7, %v103_v1  ;;  %v463_v11 = vpop.f32.mrb[2].mxu0  ;;  %v505_v12 = vadd.f32 %v504_v10, %v111_v2  ;;  %v506_v14 = vpop.f32.mrb[2].mxu1  ;;  %v4859_v52 = vld [vmem:[%s6896_s3 + $0x668] ss:$20 sps:$4 sm:$0xff]  }
  0xf7   :  { %v464_v13 = vadd.f32 %v463_v11, %v99_v63  ;;  %v465_v15 = vpop.f32.mrb[3].mxu0  ;;  %v599_v16 = vmax.f32 %v503_v8, 0.0  ;;  %v507_v17 = vadd.f32 %v506_v14, %v107_v0  ;;  %v508_v19 = vpop.f32.mrb[3].mxu1  ;;  %v597_v20 = vmax.f32 %v460_v5, 0.0  ;;  %v4835_v5 = vld [vmem:[%s6896_s3 + $0x5c8] ss:$20 sps:$4 sm:$0xff]  }
  0xf8   :  { %v466_v18 = vadd.f32 %v465_v15, %v103_v1  ;;  %v600_v21 = vmax.f32 %v505_v12, 0.0  ;;  %v509_v23 = vadd.f32 %v508_v19, %v111_v2  ;;  %v598_v24 = vmax.f32 %v462_v9, 0.0  ;;  %v4838_v1 = vld [vmem:[%s6896_s3 + $0xd0] ss:$20 sps:$4 sm:$0xff]   ;;  %v4843_v9 = vld [vmem:[%s6896_s3 + $0x5f4] ss:$20 sps:$4 sm:$0xff]  }
  0xf9   :  { %v605_v22 = vmax.f32 %v464_v13, 0.0  ;;  %v607_v25 = vmax.f32 %v507_v17, 0.0  ;;  %v119_v63 = vrot.slane %v5736_v59, %v118_v49  ;;  %v123_v0 = vrot.slane %v5736_v59, %v122_v50  ;;  %v4841_v17 = vld [vmem:[%s6896_s3 + $0x5f0] ss:$20 sps:$4 sm:$0xff]   ;;  %v4864_v49 = vld [vmem:[%s6896_s3 + $0x174] ss:$20 sps:$4 sm:$0xff]  }
  0xfa   :  { %v606_v26 = vmax.f32 %v466_v18, 0.0  ;;  %v608_v28 = vmax.f32 %v509_v23, 0.0  ;;  %v4844_v18 = vld [vmem:[%s6896_s3 + $0xf8] ss:$20 sps:$4 sm:$0xff]  }
  0xfb   :  { %v5753_v27 = vpack.c.bf16 %v605_v22, %v597_v20  ;;  %v5755_v29 = vpack.c.bf16 %v607_v25, %v599_v16  ;;  %v4852_v23 = vld [vmem:[%s6896_s3 + $0x124] ss:$20 sps:$4 sm:$0xff]   ;;  %v4861_v50 = vld [vmem:[%s6896_s3 + $0x66c] ss:$20 sps:$4 sm:$0xff]  }
  0xfc   :  { %v5757_v30 = vpack.c.bf16 %v606_v26, %v598_v24  ;;  %v5762_v32 = vpack.c.bf16 %v608_v28, %v600_v21 }
  0xfe   :  { %2728 = vmatprep.mubr.bf16.mxu1 %v5757_v30  ;;  %2771 = vmatprep.mubr.bf16.mxu0 %v5762_v32 }
  0xff   :  { %2729 = vmatmul.mubr.bf16.vlgmr.msra.gmra.mrb[8].mxu1 %v5753_v27  ;;  %2772 = vmatmul.mubr.bf16.vlgmr.msra.gmra.mrb[8].mxu0 %v5755_v29 }
 0x100   :  { %2869 = vmatpush1.bf16.msra.mxu1 %v4808_v31  ;;  %2783 = vmatpush1.bf16.msra.mxu0 %v4805_v33  ;;  %v4849_v31 = vld [vmem:[%s6896_s3 + $0x61c] ss:$20 sps:$4 sm:$0xff]  }
 0x101   :  { %2900 = vmatprep.mubr.bf16.mxu1 %v5757_v30  ;;  %2784 = vmatprep.subr.bf16.mxu0 %v4813_v34 }
 0x102   :  { %2870 = vmatprep.subr.bf16.mxu1 %v4816_v35 }
 0x104   :  { %2871 = vmatpush1.bf16.msra.mxu1 %v4814_v36  ;;  %2785 = vmatpush1.bf16.msra.mxu0 %v4811_v37 }
 0x105   :  { %2872 = vmatprep.subr.bf16.mxu1 %v4822_v38  ;;  %2786 = vmatprep.subr.bf16.mxu0 %v4819_v39  ;;  %v4850_v38 = vld [vmem:[%s6896_s3 + $0x120] ss:$20 sps:$4 sm:$0xff]  }
 0x108   :  { %2873 = vmatpush1.bf16.msra.mxu1 %v4820_v40  ;;  %2787 = vmatpush1.bf16.msra.mxu0 %v4817_v41  ;;  %v4847_v41 = vld [vmem:[%s6896_s3 + $0x618] ss:$20 sps:$4 sm:$0xff]  }
 0x109   :  { %2874 = vmatprep.subr.bf16.mxu1 %v4828_v42  ;;  %2788 = vmatprep.subr.bf16.mxu0 %v4825_v43  ;;  %v4858_v42 = vld [vmem:[%s6896_s3 + $0x14c] ss:$20 sps:$4 sm:$0xff]  }
 0x10c   :  { %2875 = vmatpush1.bf16.msra.mxu1 %v4826_v44  ;;  %2789 = vmatpush1.bf16.msra.mxu0 %v4823_v45  ;;  %v4855_v44 = vld [vmem:[%s6896_s3 + $0x644] ss:$20 sps:$4 sm:$0xff]  }
 0x10d   :  { %2876 = vmatprep.subr.bf16.mxu1 %v4834_v46  ;;  %2790 = vmatprep.subr.bf16.mxu0 %v4831_v48  ;;  %v4856_v46 = vld [vmem:[%s6896_s3 + $0x148] ss:$20 sps:$4 sm:$0xff]   ;;  %v4853_v48 = vld [vmem:[%s6896_s3 + $0x640] ss:$20 sps:$4 sm:$0xff]  }
 0x110   :  { %2877 = vmatpush1.bf16.msra.mxu1 %v4832_v51  ;;  %v545_v2 = vpop.f32.mrb[4].mxu0  ;;  %2791 = vmatpush1.bf16.msra.mxu0 %v4829_v53  ;;  %v4862_v51 = vld [vmem:[%s6896_s3 + $0x170] ss:$20 sps:$4 sm:$0xff]  }
 0x111   :  { %2878 = vmatprep.subr.bf16.mxu1 %v4840_v54  ;;  %v546_v7 = vadd.f32 %v545_v2, %v115_v55  ;;  %v547_v8 = vpop.f32.mrb[5].mxu0  ;;  %2792 = vmatprep.subr.bf16.mxu0 %v4837_v56  ;;  %v588_v59 = vpop.f32.mrb[4].mxu1  ;;  %v4870_v53 = vld [vmem:[%s6896_s3 + $0x19c] ss:$20 sps:$4 sm:$0xff]   ;;  %v4867_v54 = vld [vmem:[%s6896_s3 + $0x694] ss:$20 sps:$4 sm:$0xff]  }
 0x112   :  { %v548_v10 = vadd.f32 %v547_v8, %v119_v63  ;;  %v549_v11 = vpop.f32.mrb[6].mxu0  ;;  %v589_v15 = vadd.f32 %v588_v59, %v123_v0  ;;  %v590_v16 = vpop.f32.mrb[5].mxu1  ;;  %v4865_v56 = vld [vmem:[%s6896_s3 + $0x690] ss:$20 sps:$4 sm:$0xff]   ;;  %v4871_v2 = vld [vmem:[%s6896_s3 + $0x6b8] ss:$20 sps:$4 sm:$0xff]  }
 0x113   :  { %v601_v12 = vmax.f32 %v546_v7, 0.0  ;;  %v550_v13 = vadd.f32 %v549_v11, %v115_v55  ;;  %v551_v14 = vpop.f32.mrb[7].mxu0  ;;  %v591_v21 = vadd.f32 %v590_v16, %v127_v4  ;;  %v592_v22 = vpop.f32.mrb[6].mxu1  ;;  %v4868_v55 = vld [vmem:[%s6896_s3 + $0x198] ss:$20 sps:$4 sm:$0xff]  }
 0x114   :  { %2879 = vmatpush1.bf16.msra.mxu1 %v4838_v1  ;;  %v602_v19 = vmax.f32 %v548_v10, 0.0  ;;  %v552_v20 = vadd.f32 %v551_v14, %v119_v63  ;;  %2793 = vmatpush1.bf16.msra.mxu0 %v4835_v5  ;;  %v603_v25 = vmax.f32 %v589_v15, 0.0  ;;  %v593_v26 = vadd.f32 %v592_v22, %v123_v0  ;;  %v594_v28 = vpop.f32.mrb[7].mxu1  ;;  %v4876_v63 = vld [vmem:[%s6896_s3 + $0x1c4] ss:$20 sps:$4 sm:$0xff]  }
 0x115   :  { %2880 = vmatprep.subr.bf16.mxu1 %v4846_v6  ;;  %v609_v24 = vmax.f32 %v550_v13, 0.0  ;;  %2794 = vmatprep.subr.bf16.mxu0 %v4843_v9  ;;  %v604_v34 = vmax.f32 %v591_v21, 0.0  ;;  %v595_v35 = vadd.f32 %v594_v28, %v127_v4  ;;  %v4873_v0 = vld [vmem:[%s6896_s3 + $0x6bc] ss:$20 sps:$4 sm:$0xff]   ;;  %v4874_v1 = vld [vmem:[%s6896_s3 + $0x1c0] ss:$20 sps:$4 sm:$0xff]  }
 0x116   :  { %v610_v33 = vmax.f32 %v552_v20, 0.0  ;;  %v611_v37 = vmax.f32 %v593_v26, 0.0  ;;  %v4882_v4 = vld [vmem:[%s6896_s3 + $0x1ec] ss:$20 sps:$4 sm:$0xff]   ;;  %v4879_v5 = vld [vmem:[%s6896_s3 + $0x6e4] ss:$20 sps:$4 sm:$0xff]  }
 0x117   :  { %v5860_v36 = vpack.c.bf16 %v609_v24, %v601_v12  ;;  %v612_v40 = vmax.f32 %v595_v35, 0.0  ;;  %v4880_v6 = vld [vmem:[%s6896_s3 + $0x1e8] ss:$20 sps:$4 sm:$0xff]   ;;  %v4877_v7 = vld [vmem:[%s6896_s3 + $0x6e0] ss:$20 sps:$4 sm:$0xff]  }
 0x118   :  { %2881 = vmatpush1.bf16.msra.mxu1 %v4844_v18  ;;  %v5865_v39 = vpack.c.bf16 %v610_v33, %v602_v19  ;;  %2795 = vmatpush1.bf16.msra.mxu0 %v4841_v17  ;;  %v5873_v43 = vpack.c.bf16 %v611_v37, %v603_v25  ;;  %v4888_v8 = vld [vmem:[%s6896_s3 + $0x214] ss:$20 sps:$4 sm:$0xff]   ;;  %v4885_v9 = vld [vmem:[%s6896_s3 + $0x70c] ss:$20 sps:$4 sm:$0xff]   ;;  %v4886_v10 = vld [vmem:[%s6896_s3 + $0x210] ss:$20 sps:$4 sm:$0xff]  }
 0x119   :  { %2882 = vmatprep.subr.bf16.mxu1 %v4852_v23  ;;  %2796 = vmatprep.subr.bf16.mxu0 %v4849_v31  ;;  %v5879_v45 = vpack.c.bf16 %v612_v40, %v604_v34  ;;  %v4883_v11 = vld [vmem:[%s6896_s3 + $0x708] ss:$20 sps:$4 sm:$0xff]   ;;  %v4892_v13 = vld [vmem:[%s6896_s3 + $0x238] ss:$20 sps:$4 sm:$0xff]   ;;  %v4889_v14 = vld [vmem:[%s6896_s3 + $0x730] ss:$20 sps:$4 sm:$0xff]  }
 0x11a   :  { %2814 = vmatprep.mubr.bf16.mxu0 %v5865_v39  ;;  %v4894_v59 = vld [vmem:[%s6896_s3 + $0x23c] ss:$20 sps:$4 sm:$0xff]   ;;  %v4891_v12 = vld [vmem:[%s6896_s3 + $0x734] ss:$20 sps:$4 sm:$0xff]   ;;  %v4900_v15 = vld [vmem:[%s6896_s3 + $0x264] ss:$20 sps:$4 sm:$0xff]  }
 0x11b   :  { %v4897_v16 = vld [vmem:[%s6896_s3 + $0x75c] ss:$20 sps:$4 sm:$0xff]   ;;  %v4898_v17 = vld [vmem:[%s6896_s3 + $0x260] ss:$20 sps:$4 sm:$0xff]   ;;  %v4895_v18 = vld [vmem:[%s6896_s3 + $0x758] ss:$20 sps:$4 sm:$0xff]  }
 0x11c   :  { %2883 = vmatpush1.bf16.msra.mxu1 %v4850_v38  ;;  %2797 = vmatpush1.bf16.msra.mxu0 %v4847_v41  ;;  %v4906_v19 = vld [vmem:[%s6896_s3 + $0x28c] ss:$20 sps:$4 sm:$0xff]   ;;  %v4903_v20 = vld [vmem:[%s6896_s3 + $0x784] ss:$20 sps:$4 sm:$0xff]   ;;  %v4904_v21 = vld [vmem:[%s6896_s3 + $0x288] ss:$20 sps:$4 sm:$0xff]  }
 0x11d   :  { %2884 = vmatprep.subr.bf16.mxu1 %v4858_v42  ;;  %2798 = vmatprep.subr.bf16.mxu0 %v4855_v44  ;;  %v4901_v22 = vld [vmem:[%s6896_s3 + $0x780] ss:$20 sps:$4 sm:$0xff]   ;;  %v4910_v25 = vld [vmem:[%s6896_s3 + $0x2b0] ss:$20 sps:$4 sm:$0xff]   ;;  %v4907_v26 = vld [vmem:[%s6896_s3 + $0x7a8] ss:$20 sps:$4 sm:$0xff]  }
 0x11e   :  { %v4912_v23 = vld [vmem:[%s6896_s3 + $0x2b4] ss:$20 sps:$4 sm:$0xff]   ;;  %v4909_v24 = vld [vmem:[%s6896_s3 + $0x7ac] ss:$20 sps:$4 sm:$0xff]   ;;  %v4918_v28 = vld [vmem:[%s6896_s3 + $0x2dc] ss:$20 sps:$4 sm:$0xff]  }
 0x11f   :  { %v4915_v31 = vld [vmem:[%s6896_s3 + $0x7d4] ss:$20 sps:$4 sm:$0xff]   ;;  %v4916_v33 = vld [vmem:[%s6896_s3 + $0x2d8] ss:$20 sps:$4 sm:$0xff]   ;;  %v4913_v34 = vld [vmem:[%s6896_s3 + $0x7d0] ss:$20 sps:$4 sm:$0xff]  }
 0x120   :  { %2885 = vmatpush1.bf16.msra.mxu1 %v4856_v46  ;;  %2799 = vmatpush1.bf16.msra.mxu0 %v4853_v48  ;;  %v4924_v35 = vld [vmem:[%s6896_s3 + $0x304] ss:$20 sps:$4 sm:$0xff]   ;;  %v4921_v37 = vld [vmem:[%s6896_s3 + $0x7fc] ss:$20 sps:$4 sm:$0xff]   ;;  %v4922_v38 = vld [vmem:[%s6896_s3 + $0x300] ss:$20 sps:$4 sm:$0xff]  }
 0x121   :  { %2886 = vmatprep.subr.bf16.mxu1 %v4864_v49  ;;  %2800 = vmatprep.subr.bf16.mxu0 %v4861_v50  ;;  %v4919_v40 = vld [vmem:[%s6896_s3 + $0x7f8] ss:$20 sps:$4 sm:$0xff]   ;;  %v4928_v44 = vld [vmem:[%s6896_s3 + $0x328] ss:$20 sps:$4 sm:$0xff]   ;;  %v4925_v46 = vld [vmem:[%s6896_s3 + $0x820] ss:$20 sps:$4 sm:$0xff]  }
 0x122   :  { %v4930_v41 = vld [vmem:[%s6896_s3 + $0x32c] ss:$20 sps:$4 sm:$0xff]   ;;  %v4927_v42 = vld [vmem:[%s6896_s3 + $0x824] ss:$20 sps:$4 sm:$0xff]   ;;  %v4936_v48 = vld [vmem:[%s6896_s3 + $0x354] ss:$20 sps:$4 sm:$0xff]  }
 0x123   :  { %v4933_v49 = vld [vmem:[%s6896_s3 + $0x84c] ss:$20 sps:$4 sm:$0xff]   ;;  %v4934_v50 = vld [vmem:[%s6896_s3 + $0x350] ss:$20 sps:$4 sm:$0xff]  }
 0x124   :  { %2887 = vmatpush1.bf16.msra.mxu1 %v4862_v51  ;;  %2801 = vmatpush1.bf16.msra.mxu0 %v4859_v52  ;;  %v4931_v51 = vld [vmem:[%s6896_s3 + $0x848] ss:$20 sps:$4 sm:$0xff]  }
 0x125   :  { %2888 = vmatprep.subr.bf16.mxu1 %v4870_v53  ;;  %2802 = vmatprep.subr.bf16.mxu0 %v4867_v54  ;;  %v4942_v52 = vld [vmem:[%s6896_s3 + $0x37c] ss:$20 sps:$4 sm:$0xff]   ;;  %v4939_v53 = vld [vmem:[%s6896_s3 + $0x874] ss:$20 sps:$4 sm:$0xff]   ;;  %v4940_v54 = vld [vmem:[%s6896_s3 + $0x378] ss:$20 sps:$4 sm:$0xff]  }
 0x128   :  { %2889 = vmatpush1.bf16.msra.mxu1 %v4868_v55  ;;  %2803 = vmatpush1.bf16.msra.mxu0 %v4865_v56  ;;  %v4937_v55 = vld [vmem:[%s6896_s3 + $0x870] ss:$20 sps:$4 sm:$0xff]  }
 0x129   :  { %2890 = vmatprep.subr.bf16.mxu1 %v4876_v63  ;;  %2804 = vmatprep.subr.bf16.mxu0 %v4873_v0  ;;  %v4948_v56 = vld [vmem:[%s6896_s3 + $0x3a4] ss:$20 sps:$4 sm:$0xff]   ;;  %v4945_v63 = vld [vmem:[%s6896_s3 + $0x89c] ss:$20 sps:$4 sm:$0xff]   ;;  %v4946_v0 = vld [vmem:[%s6896_s3 + $0x3a0] ss:$20 sps:$4 sm:$0xff]  }
 0x12c   :  { %2891 = vmatpush1.bf16.msra.mxu1 %v4874_v1  ;;  %2805 = vmatpush1.bf16.msra.mxu0 %v4871_v2  ;;  %v4943_v1 = vld [vmem:[%s6896_s3 + $0x898] ss:$20 sps:$4 sm:$0xff]  }
 0x12d   :  { %2892 = vmatprep.subr.bf16.mxu1 %v4882_v4  ;;  %2806 = vmatprep.subr.bf16.mxu0 %v4879_v5  ;;  %v4954_v2 = vld [vmem:[%s6896_s3 + $0x3cc] ss:$20 sps:$4 sm:$0xff]   ;;  %v4951_v4 = vld [vmem:[%s6896_s3 + $0x8c4] ss:$20 sps:$4 sm:$0xff]   ;;  %v4952_v5 = vld [vmem:[%s6896_s3 + $0x3c8] ss:$20 sps:$4 sm:$0xff]  }
 0x130   :  { %2893 = vmatpush1.bf16.msra.mxu1 %v4880_v6  ;;  %2807 = vmatpush1.bf16.msra.mxu0 %v4877_v7  ;;  %v4949_v6 = vld [vmem:[%s6896_s3 + $0x8c0] ss:$20 sps:$4 sm:$0xff]  }
 0x131   :  { %2894 = vmatprep.subr.bf16.mxu1 %v4888_v8  ;;  %2808 = vmatprep.subr.bf16.mxu0 %v4885_v9  ;;  %v4960_v7 = vld [vmem:[%s6896_s3 + $0x3f4] ss:$20 sps:$4 sm:$0xff]   ;;  %v4957_v8 = vld [vmem:[%s6896_s3 + $0x8ec] ss:$20 sps:$4 sm:$0xff]   ;;  %v4958_v9 = vld [vmem:[%s6896_s3 + $0x3f0] ss:$20 sps:$4 sm:$0xff]  }
 0x134   :  { %2895 = vmatpush1.bf16.msra.mxu1 %v4886_v10  ;;  %2809 = vmatpush1.bf16.msra.mxu0 %v4883_v11  ;;  %v4955_v10 = vld [vmem:[%s6896_s3 + $0x8e8] ss:$20 sps:$4 sm:$0xff]  }
 0x135   :  { %2896 = vmatprep.subr.bf16.mxu1 %v4894_v59  ;;  %2810 = vmatprep.subr.bf16.mxu0 %v4891_v12  ;;  %v4966_v11 = vld [vmem:[%s6896_s3 + $0x41c] ss:$20 sps:$4 sm:$0xff]   ;;  %v4963_v59 = vld [vmem:[%s6896_s3 + $0x914] ss:$20 sps:$4 sm:$0xff]   ;;  %v4964_v12 = vld [vmem:[%s6896_s3 + $0x418] ss:$20 sps:$4 sm:$0xff]  }
 0x138   :  { %2897 = vmatpush1.bf16.msra.mxu1 %v4892_v13  ;;  %2811 = vmatpush1.bf16.msra.mxu0 %v4889_v14  ;;  %v4961_v13 = vld [vmem:[%s6896_s3 + $0x910] ss:$20 sps:$4 sm:$0xff]  }
 0x139   :  { %2898 = vmatprep.subr.bf16.mxu1 %v4900_v15  ;;  %2812 = vmatprep.subr.bf16.mxu0 %v4897_v16  ;;  %v4972_v14 = vld [vmem:[%s6896_s3 + $0x444] ss:$20 sps:$4 sm:$0xff]   ;;  %v4969_v15 = vld [vmem:[%s6896_s3 + $0x93c] ss:$20 sps:$4 sm:$0xff]   ;;  %v4970_v16 = vld [vmem:[%s6896_s3 + $0x440] ss:$20 sps:$4 sm:$0xff]  }
 0x13c   :  { %2899 = vmatpush1.bf16.msra.mxu1 %v4898_v17  ;;  %2813 = vmatpush1.bf16.msra.mxu0 %v4895_v18  ;;  %v4967_v17 = vld [vmem:[%s6896_s3 + $0x938] ss:$20 sps:$4 sm:$0xff]  }
 0x13d   :  { %2911 = vmatprep.subr.bf16.mxu1 %v4906_v19  ;;  %2825 = vmatprep.subr.bf16.mxu0 %v4903_v20  ;;  %v4978_v18 = vld [vmem:[%s6896_s3 + $0x46c] ss:$20 sps:$4 sm:$0xff]   ;;  %v4975_v19 = vld [vmem:[%s6896_s3 + $0x964] ss:$20 sps:$4 sm:$0xff]   ;;  %v4976_v20 = vld [vmem:[%s6896_s3 + $0x468] ss:$20 sps:$4 sm:$0xff]  }
 0x13f   :  { %2901 = vmatmul.mubr.bf16.vlgmr.msra.gmra.mrb[12].mxu1 %v5753_v27  ;;  %2815 = vmatmul.mubr.bf16.vlgmr.msra.gmra.mrb[8].mxu0 %v5860_v36 }
 0x140   :  { %2912 = vmatpush1.bf16.msra.mxu1 %v4904_v21  ;;  %2826 = vmatpush1.bf16.msra.mxu0 %v4901_v22  ;;  %v4973_v21 = vld [vmem:[%s6896_s3 + $0x960] ss:$20 sps:$4 sm:$0xff]  }
 0x141   :  { %2913 = vmatprep.subr.bf16.mxu1 %v4912_v23  ;;  %2827 = vmatprep.subr.bf16.mxu0 %v4909_v24  ;;  %v4984_v22 = vld [vmem:[%s6896_s3 + $0x494] ss:$20 sps:$4 sm:$0xff]   ;;  %v4981_v23 = vld [vmem:[%s6896_s3 + $0x98c] ss:$20 sps:$4 sm:$0xff]   ;;  %v4982_v24 = vld [vmem:[%s6896_s3 + $0x490] ss:$20 sps:$4 sm:$0xff]  }
 0x142   :  { %2943 = vmatprep.mubr.bf16.mxu1 %v5762_v32  ;;  %2857 = vmatprep.mubr.bf16.mxu0 %v5879_v45 }
 0x144   :  { %2914 = vmatpush1.bf16.msra.mxu1 %v4910_v25  ;;  %2828 = vmatpush1.bf16.msra.mxu0 %v4907_v26  ;;  %v4979_v25 = vld [vmem:[%s6896_s3 + $0x988] ss:$20 sps:$4 sm:$0xff]  }
 0x145   :  { %2915 = vmatprep.subr.bf16.mxu1 %v4918_v28  ;;  %2829 = vmatprep.subr.bf16.mxu0 %v4915_v31  ;;  %v4990_v26 = vld [vmem:[%s6896_s3 + $0x4bc] ss:$20 sps:$4 sm:$0xff]   ;;  %v4987_v28 = vld [vmem:[%s6896_s3 + $0x9b4] ss:$20 sps:$4 sm:$0xff]   ;;  %v4988_v31 = vld [vmem:[%s6896_s3 + $0x4b8] ss:$20 sps:$4 sm:$0xff]  }
 0x148   :  { %2916 = vmatpush1.bf16.msra.mxu1 %v4916_v33  ;;  %2830 = vmatpush1.bf16.msra.mxu0 %v4913_v34  ;;  %v4985_v33 = vld [vmem:[%s6896_s3 + $0x9b0] ss:$20 sps:$4 sm:$0xff]  }
 0x149   :  { %2917 = vmatprep.subr.bf16.mxu1 %v4924_v35  ;;  %2831 = vmatprep.subr.bf16.mxu0 %v4921_v37  ;;  %v4996_v34 = vld [vmem:[%s6896_s3 + $0x4e4] ss:$20 sps:$4 sm:$0xff]   ;;  %v4993_v35 = vld [vmem:[%s6896_s3 + $0x9dc] ss:$20 sps:$4 sm:$0xff]   ;;  %v4994_v37 = vld [vmem:[%s6896_s3 + $0x4e0] ss:$20 sps:$4 sm:$0xff]  }
 0x14c   :  { %2918 = vmatpush1.bf16.msra.mxu1 %v4922_v38  ;;  %2832 = vmatpush1.bf16.msra.mxu0 %v4919_v40  ;;  %v4991_v38 = vld [vmem:[%s6896_s3 + $0x9d8] ss:$20 sps:$4 sm:$0xff]  }
 0x14d   :  { %2919 = vmatprep.subr.bf16.mxu1 %v4930_v41  ;;  %2833 = vmatprep.subr.bf16.mxu0 %v4927_v42  ;;  %v4999_v40 = vld [vmem:[%s6896_s3 + $0x50c] ss:$20 sps:$4 sm:$0xff]   ;;  %v5000_v41 = vld [vmem:[%s6896_s3 + $0x150] ss:$20 sps:$4 sm:$0xff]   ;;  %v4997_v42 = vld [vmem:[%s6896_s3 + $0x508] ss:$20 sps:$4 sm:$0xff]  }
 0x150   :  { %2920 = vmatpush1.bf16.msra.mxu1 %v4928_v44  ;;  %2834 = vmatpush1.bf16.msra.mxu0 %v4925_v46  ;;  %v5001_v44 = vld [vmem:[%s6896_s3 + $0x10] ss:$20 sps:$4 sm:$0xff]   ;;  %v5004_v46 = vld [vmem:[%s6896_s3 + $0x534] ss:$20 sps:$4 sm:$0xff]  }
 0x151   :  { %2921 = vmatprep.subr.bf16.mxu1 %v4936_v48  ;;  %2835 = vmatprep.subr.bf16.mxu0 %v4933_v49  ;;  %v5005_v48 = vld [vmem:[%s6896_s3 + $0x178] ss:$20 sps:$4 sm:$0xff]   ;;  %v5002_v49 = vld [vmem:[%s6896_s3 + $0x530] ss:$20 sps:$4 sm:$0xff]  }
 0x154   :  { %2922 = vmatpush1.bf16.msra.mxu1 %v4934_v50  ;;  %2836 = vmatpush1.bf16.msra.mxu0 %v4931_v51  ;;  %v5006_v50 = vld [vmem:[%s6896_s3 + $0x38] ss:$20 sps:$4 sm:$0xff]   ;;  %v5009_v51 = vld [vmem:[%s6896_s3 + $0x55c] ss:$20 sps:$4 sm:$0xff]  }
 0x155   :  { %2923 = vmatprep.subr.bf16.mxu1 %v4942_v52  ;;  %2837 = vmatprep.subr.bf16.mxu0 %v4939_v53  ;;  %v5010_v52 = vld [vmem:[%s6896_s3 + $0x1a0] ss:$20 sps:$4 sm:$0xff]  }
 0x156   :  { %v5011_v53 = vld [vmem:[%s6896_s3 + $0x60] ss:$20 sps:$4 sm:$0xff]  }
 0x158   :  { %2924 = vmatpush1.bf16.msra.mxu1 %v4940_v54  ;;  %2838 = vmatpush1.bf16.msra.mxu0 %v4937_v55  ;;  %v5014_v54 = vld [vmem:[%s6896_s3 + $0x584] ss:$20 sps:$4 sm:$0xff]   ;;  %v5015_v55 = vld [vmem:[%s6896_s3 + $0x1c8] ss:$20 sps:$4 sm:$0xff]  }
 0x159   :  { %2925 = vmatprep.subr.bf16.mxu1 %v4948_v56  ;;  %2839 = vmatprep.subr.bf16.mxu0 %v4945_v63  ;;  %v5012_v56 = vld [vmem:[%s6896_s3 + $0x580] ss:$20 sps:$4 sm:$0xff]   ;;  %v5016_v63 = vld [vmem:[%s6896_s3 + $0x88] ss:$20 sps:$4 sm:$0xff]  }
 0x15c   :  { %2926 = vmatpush1.bf16.msra.mxu1 %v4946_v0  ;;  %2840 = vmatpush1.bf16.msra.mxu0 %v4943_v1  ;;  %v5019_v0 = vld [vmem:[%s6896_s3 + $0x5ac] ss:$20 sps:$4 sm:$0xff]   ;;  %v5020_v1 = vld [vmem:[%s6896_s3 + $0x1f0] ss:$20 sps:$4 sm:$0xff]  }
 0x15d   :  { %2927 = vmatprep.subr.bf16.mxu1 %v4954_v2  ;;  %2841 = vmatprep.subr.bf16.mxu0 %v4951_v4  ;;  %v5017_v2 = vld [vmem:[%s6896_s3 + $0x5a8] ss:$20 sps:$4 sm:$0xff]   ;;  %v5021_v4 = vld [vmem:[%s6896_s3 + $0xb0] ss:$20 sps:$4 sm:$0xff]  }
 0x160   :  { %2928 = vmatpush1.bf16.msra.mxu1 %v4952_v5  ;;  %2842 = vmatpush1.bf16.msra.mxu0 %v4949_v6  ;;  %v5024_v5 = vld [vmem:[%s6896_s3 + $0x5d4] ss:$20 sps:$4 sm:$0xff]   ;;  %v5025_v6 = vld [vmem:[%s6896_s3 + $0x218] ss:$20 sps:$4 sm:$0xff]  }
 0x161   :  { %2929 = vmatprep.subr.bf16.mxu1 %v4960_v7  ;;  %2843 = vmatprep.subr.bf16.mxu0 %v4957_v8  ;;  %v5022_v7 = vld [vmem:[%s6896_s3 + $0x5d0] ss:$20 sps:$4 sm:$0xff]   ;;  %v5026_v8 = vld [vmem:[%s6896_s3 + $0xd8] ss:$20 sps:$4 sm:$0xff]  }
 0x164   :  { %2930 = vmatpush1.bf16.msra.mxu1 %v4958_v9  ;;  %2844 = vmatpush1.bf16.msra.mxu0 %v4955_v10  ;;  %v5029_v9 = vld [vmem:[%s6896_s3 + $0x5fc] ss:$20 sps:$4 sm:$0xff]   ;;  %v5030_v10 = vld [vmem:[%s6896_s3 + $0x240] ss:$20 sps:$4 sm:$0xff]  }
 0x165   :  { %2931 = vmatprep.subr.bf16.mxu1 %v4966_v11  ;;  %2845 = vmatprep.subr.bf16.mxu0 %v4963_v59  ;;  %v5027_v11 = vld [vmem:[%s6896_s3 + $0x5f8] ss:$20 sps:$4 sm:$0xff]   ;;  %v5031_v59 = vld [vmem:[%s6896_s3 + $0x100] ss:$20 sps:$4 sm:$0xff]  }
 0x168   :  { %2932 = vmatpush1.bf16.msra.mxu1 %v4964_v12  ;;  %2846 = vmatpush1.bf16.msra.mxu0 %v4961_v13  ;;  %v5034_v12 = vld [vmem:[%s6896_s3 + $0x624] ss:$20 sps:$4 sm:$0xff]   ;;  %v5035_v13 = vld [vmem:[%s6896_s3 + $0x268] ss:$20 sps:$4 sm:$0xff]  }
 0x169   :  { %2933 = vmatprep.subr.bf16.mxu1 %v4972_v14  ;;  %2847 = vmatprep.subr.bf16.mxu0 %v4969_v15  ;;  %v5032_v14 = vld [vmem:[%s6896_s3 + $0x620] ss:$20 sps:$4 sm:$0xff]   ;;  %v5036_v15 = vld [vmem:[%s6896_s3 + $0x128] ss:$20 sps:$4 sm:$0xff]  }
 0x16c   :  { %2934 = vmatpush1.bf16.msra.mxu1 %v4970_v16  ;;  %2848 = vmatpush1.bf16.msra.mxu0 %v4967_v17  ;;  %v5039_v16 = vld [vmem:[%s6896_s3 + $0x64c] ss:$20 sps:$4 sm:$0xff]   ;;  %v5040_v17 = vld [vmem:[%s6896_s3 + $0x650] ss:$20 sps:$4 sm:$0xff]  }
 0x16d   :  { %2935 = vmatprep.subr.bf16.mxu1 %v4978_v18  ;;  %2849 = vmatprep.subr.bf16.mxu0 %v4975_v19  ;;  %v5037_v18 = vld [vmem:[%s6896_s3 + $0x648] ss:$20 sps:$4 sm:$0xff]   ;;  %v5041_v19 = vld [vmem:[%s6896_s3 + $0x510] ss:$20 sps:$4 sm:$0xff]  }
 0x170   :  { %2936 = vmatpush1.bf16.msra.mxu1 %v4976_v20  ;;  %2850 = vmatpush1.bf16.msra.mxu0 %v4973_v21  ;;  %v5044_v20 = vld [vmem:[%s6896_s3 + $0x674] ss:$20 sps:$4 sm:$0xff]   ;;  %v5045_v21 = vld [vmem:[%s6896_s3 + $0x678] ss:$20 sps:$4 sm:$0xff]  }
 0x171   :  { %2937 = vmatprep.subr.bf16.mxu1 %v4984_v22  ;;  %2851 = vmatprep.subr.bf16.mxu0 %v4981_v23  ;;  %v5042_v22 = vld [vmem:[%s6896_s3 + $0x670] ss:$20 sps:$4 sm:$0xff]   ;;  %v5046_v23 = vld [vmem:[%s6896_s3 + $0x538] ss:$20 sps:$4 sm:$0xff]  }
 0x174   :  { %2938 = vmatpush1.bf16.msra.mxu1 %v4982_v24  ;;  %2852 = vmatpush1.bf16.msra.mxu0 %v4979_v25  ;;  %v5049_v24 = vld [vmem:[%s6896_s3 + $0x69c] ss:$20 sps:$4 sm:$0xff]   ;;  %v5050_v25 = vld [vmem:[%s6896_s3 + $0x6a0] ss:$20 sps:$4 sm:$0xff]  }
 0x175   :  { %2939 = vmatprep.subr.bf16.mxu1 %v4990_v26  ;;  %2853 = vmatprep.subr.bf16.mxu0 %v4987_v28  ;;  %v5051_v26 = vld [vmem:[%s6896_s3 + $0x560] ss:$20 sps:$4 sm:$0xff]   ;;  %v5054_v28 = vld [vmem:[%s6896_s3 + $0x6c4] ss:$20 sps:$4 sm:$0xff]  }
 0x178   :  { %2940 = vmatpush1.bf16.msra.mxu1 %v4988_v31  ;;  %2854 = vmatpush1.bf16.msra.mxu0 %v4985_v33  ;;  %v5055_v31 = vld [vmem:[%s6896_s3 + $0x6c8] ss:$20 sps:$4 sm:$0xff]  }
 0x179   :  { %2941 = vmatprep.subr.bf16.mxu1 %v4996_v34  ;;  %2855 = vmatprep.subr.bf16.mxu0 %v4993_v35  ;;  %v5056_v33 = vld [vmem:[%s6896_s3 + $0x588] ss:$20 sps:$4 sm:$0xff]   ;;  %v5059_v34 = vld [vmem:[%s6896_s3 + $0x6ec] ss:$20 sps:$4 sm:$0xff]   ;;  %v5060_v35 = vld [vmem:[%s6896_s3 + $0x6f0] ss:$20 sps:$4 sm:$0xff]  }
 0x17c   :  { %2942 = vmatpush1.bf16.msra.mxu1 %v4994_v37  ;;  %2856 = vmatpush1.bf16.msra.mxu0 %v4991_v38  ;;  %v5057_v37 = vld [vmem:[%s6896_s3 + $0x6e8] ss:$20 sps:$4 sm:$0xff]   ;;  %v5061_v38 = vld [vmem:[%s6896_s3 + $0x5b0] ss:$20 sps:$4 sm:$0xff]  }
 0x17d   :  { %2954 = vmatprep.subr.bf16.mxu1 %v4999_v40  ;;  %4533 = vmatprep.subr.bf16.mxu0 %v5000_v41  ;;  %v5064_v40 = vld [vmem:[%s6896_s3 + $0x714] ss:$20 sps:$4 sm:$0xff]   ;;  %v5065_v41 = vld [vmem:[%s6896_s3 + $0x718] ss:$20 sps:$4 sm:$0xff]  }
 0x17f   :  { %2944 = vmatmul.mubr.bf16.vlgmr.msra.gmra.mrb[12].mxu1 %v5755_v29  ;;  %2858 = vmatmul.mubr.bf16.vlgmr.msra.gmra.mrb[8].mxu0 %v5873_v43 }
 0x180   :  { %2955 = vmatpush1.bf16.msra.mxu1 %v4997_v42  ;;  %4534 = vmatpush3.bf16.msra.mxu0 %v5001_v44  ;;  %v5062_v42 = vld [vmem:[%s6896_s3 + $0x710] ss:$20 sps:$4 sm:$0xff]   ;;  %v5066_v44 = vld [vmem:[%s6896_s3 + $0x5d8] ss:$20 sps:$4 sm:$0xff]  }
 0x181   :  { %3072 = vmatprep.mubr.bf16.mxu0 %v5757_v30  ;;  %2956 = vmatprep.subr.bf16.mxu1 %v5004_v46  ;;  %v5007_v30 = vld [vmem:[%s6896_s3 + $0x558] ss:$20 sps:$4 sm:$0xff]   ;;  %v5069_v46 = vld [vmem:[%s6896_s3 + $0x73c] ss:$20 sps:$4 sm:$0xff]  }
 0x182   :  { %4535 = vmatprep.subr.bf16.mxu0 %v5005_v48  ;;  %2986 = vmatprep.mubr.bf16.mxu1 %v5865_v39  ;;  %v5070_v48 = vld [vmem:[%s6896_s3 + $0x740] ss:$20 sps:$4 sm:$0xff]  }
 0x184   :  { %2957 = vmatpush1.bf16.msra.mxu1 %v5002_v49  ;;  %4536 = vmatpush3.bf16.msra.mxu0 %v5006_v50  ;;  %v5067_v49 = vld [vmem:[%s6896_s3 + $0x738] ss:$20 sps:$4 sm:$0xff]   ;;  %v5071_v50 = vld [vmem:[%s6896_s3 + $0x600] ss:$20 sps:$4 sm:$0xff]  }
 0x185   :  { %2958 = vmatprep.subr.bf16.mxu1 %v5009_v51  ;;  %4537 = vmatprep.subr.bf16.mxu0 %v5010_v52  ;;  %v5074_v51 = vld [vmem:[%s6896_s3 + $0x764] ss:$20 sps:$4 sm:$0xff]   ;;  %v5075_v52 = vld [vmem:[%s6896_s3 + $0x768] ss:$20 sps:$4 sm:$0xff]  }
 0x188   :  { %2959 = vmatpush1.bf16.msra.mxu1 %v5007_v30  ;;  %4538 = vmatpush3.bf16.msra.mxu0 %v5011_v53  ;;  %v5072_v30 = vld [vmem:[%s6896_s3 + $0x760] ss:$20 sps:$4 sm:$0xff]   ;;  %v5076_v53 = vld [vmem:[%s6896_s3 + $0x628] ss:$20 sps:$4 sm:$0xff]  }
 0x189   :  { %2960 = vmatprep.subr.bf16.mxu1 %v5014_v54  ;;  %4539 = vmatprep.subr.bf16.mxu0 %v5015_v55  ;;  %v5079_v54 = vld [vmem:[%s6896_s3 + $0x78c] ss:$20 sps:$4 sm:$0xff]  }
 0x18a   :  { %v5143_v55 = vld [vmem:[%s6899_s5 + $0x4] ss:$8 sps:$4 sm:$0xff]  }
 0x18c   :  { %2961 = vmatpush1.bf16.msra.mxu1 %v5012_v56  ;;  %4540 = vmatpush3.bf16.msra.mxu0 %v5016_v63  ;;  %v5077_v56 = vld [vmem:[%s6896_s3 + $0x788] ss:$20 sps:$4 sm:$0xff]  }
 0x18d   :  { %2962 = vmatprep.subr.bf16.mxu1 %v5019_v0  ;;  %4541 = vmatprep.subr.bf16.mxu0 %v5020_v1  ;;  %v5082_v63 = vld [vmem:[%s6896_s3 + $0x7b4] ss:$20 sps:$4 sm:$0xff]  }
 0x18e   :  { %v5141_v0 = vld [vmem:[%s6899_s5] ss:$8 sps:$4 sm:$0xff]   ;;  %v5148_v1 = vld [vmem:[%s6899_s5 + $0x14] ss:$8 sps:$4 sm:$0xff]  }
 0x190   :  { %2963 = vmatpush1.bf16.msra.mxu1 %v5017_v2  ;;  %4542 = vmatpush3.bf16.msra.mxu0 %v5021_v4  ;;  %v5080_v2 = vld [vmem:[%s6896_s3 + $0x7b0] ss:$20 sps:$4 sm:$0xff]  }
 0x191   :  { %2964 = vmatprep.subr.bf16.mxu1 %v5024_v5  ;;  %4543 = vmatprep.subr.bf16.mxu0 %v5025_v6  ;;  %v5085_v4 = vld [vmem:[%s6896_s3 + $0x7dc] ss:$20 sps:$4 sm:$0xff]   ;;  %v5083_v6 = vld [vmem:[%s6896_s3 + $0x7d8] ss:$20 sps:$4 sm:$0xff]  }
 0x192   :  { %v5146_v5 = vld [vmem:[%s6899_s5 + $0x10] ss:$8 sps:$4 sm:$0xff]  }
 0x194   :  { %2965 = vmatpush1.bf16.msra.mxu1 %v5022_v7  ;;  %4544 = vmatpush3.bf16.msra.mxu0 %v5026_v8  ;;  %v5088_v7 = vld [vmem:[%s6896_s3 + $0x804] ss:$20 sps:$4 sm:$0xff]   ;;  %v5151_v8 = vld [vmem:[%s6899_s5 + $0x20] ss:$8 sps:$4 sm:$0xff]  }
 0x195   :  { %2966 = vmatprep.subr.bf16.mxu1 %v5029_v9  ;;  %4545 = vmatprep.subr.bf16.mxu0 %v5030_v10  ;;  %v5158_v9 = vld [vmem:[%s6899_s5 + $0x34] ss:$8 sps:$4 sm:$0xff]  }
 0x196   :  { %v5086_v10 = vld [vmem:[%s6896_s3 + $0x800] ss:$20 sps:$4 sm:$0xff]  }
 0x198   :  { %2967 = vmatpush1.bf16.msra.mxu1 %v5027_v11  ;;  %4546 = vmatpush3.bf16.msra.mxu0 %v5031_v59  ;;  %v5091_v11 = vld [vmem:[%s6896_s3 + $0x82c] ss:$20 sps:$4 sm:$0xff]   ;;  %v5156_v59 = vld [vmem:[%s6899_s5 + $0x30] ss:$8 sps:$4 sm:$0xff]  }
 0x199   :  { %2968 = vmatprep.subr.bf16.mxu1 %v5034_v12  ;;  %4547 = vmatprep.subr.bf16.mxu0 %v5035_v13  ;;  %v5163_v12 = vld [vmem:[%s6899_s5 + $0x44] ss:$8 sps:$4 sm:$0xff]   ;;  %v5089_v13 = vld [vmem:[%s6896_s3 + $0x828] ss:$20 sps:$4 sm:$0xff]  }
 0x19c   :  { %2969 = vmatpush1.bf16.msra.mxu1 %v5032_v14  ;;  %4548 = vmatpush3.bf16.msra.mxu0 %v5036_v15  ;;  %v5094_v14 = vld [vmem:[%s6896_s3 + $0x854] ss:$20 sps:$4 sm:$0xff]  }
 0x19d   :  { %2970 = vmatprep.subr.bf16.mxu1 %v5039_v16  ;;  %4577 = vmatprep.subr.bf16.mxu0 %v5040_v17  ;;  %v5161_v15 = vld [vmem:[%s6899_s5 + $0x40] ss:$8 sps:$4 sm:$0xff]   ;;  %v5168_v16 = vld [vmem:[%s6899_s5 + $0x54] ss:$8 sps:$4 sm:$0xff]   ;;  %v5092_v17 = vld [vmem:[%s6896_s3 + $0x850] ss:$20 sps:$4 sm:$0xff]  }
 0x19f   :  { %3073 = vmatmul.mubr.bf16.vlgmr.msra.gmra.mrb[12].mxu0 %v5753_v27  ;;  %v5047_v27 = vld [vmem:[%s6896_s3 + $0x698] ss:$20 sps:$4 sm:$0xff]  }
 0x1a0   :  { %2971 = vmatpush1.bf16.msra.mxu1 %v5037_v18  ;;  %4578 = vmatpush3.bf16.msra.mxu0 %v5041_v19  ;;  %v5097_v18 = vld [vmem:[%s6896_s3 + $0x87c] ss:$20 sps:$4 sm:$0xff]  }
 0x1a1   :  { %2972 = vmatprep.subr.bf16.mxu1 %v5044_v20  ;;  %4579 = vmatprep.subr.bf16.mxu0 %v5045_v21  ;;  %v5166_v20 = vld [vmem:[%s6899_s5 + $0x50] ss:$8 sps:$4 sm:$0xff]  }
 0x1a2   :  { %3154 = vmatprep.mubr.bf16.mxu0 %v5865_v39  ;;  %v5052_v39 = vld [vmem:[%s6896_s3 + $0x6c0] ss:$20 sps:$4 sm:$0xff]  }
 0x1a4   :  { %2973 = vmatpush1.bf16.msra.mxu1 %v5042_v22  ;;  %4580 = vmatpush3.bf16.msra.mxu0 %v5046_v23  ;;  %v5173_v22 = vld [vmem:[%s6899_s5 + $0x64] ss:$8 sps:$4 sm:$0xff]  }
 0x1a5   :  { %2974 = vmatprep.subr.bf16.mxu1 %v5049_v24  ;;  %4581 = vmatprep.subr.bf16.mxu0 %v5050_v25  ;;  %v5095_v24 = vld [vmem:[%s6896_s3 + $0x878] ss:$20 sps:$4 sm:$0xff]  }
 0x1a8   :  { %2975 = vmatpush1.bf16.msra.mxu1 %v5047_v27  ;;  %4582 = vmatpush3.bf16.msra.mxu0 %v5051_v26  ;;  %v5100_v27 = vld [vmem:[%s6896_s3 + $0x8a4] ss:$20 sps:$4 sm:$0xff]   ;;  %v5171_v26 = vld [vmem:[%s6899_s5 + $0x60] ss:$8 sps:$4 sm:$0xff]  }
 0x1a9   :  { %2976 = vmatprep.subr.bf16.mxu1 %v5054_v28  ;;  %4583 = vmatprep.subr.bf16.mxu0 %v5055_v31  ;;  %v5178_v28 = vld [vmem:[%s6899_s5 + $0x74] ss:$8 sps:$4 sm:$0xff]  }
 0x1aa   :  { %v5098_v31 = vld [vmem:[%s6896_s3 + $0x8a0] ss:$20 sps:$4 sm:$0xff]  }
 0x1ac   :  { %2977 = vmatpush1.bf16.msra.mxu1 %v5052_v39  ;;  %4584 = vmatpush3.bf16.msra.mxu0 %v5056_v33  ;;  %v5103_v39 = vld [vmem:[%s6896_s3 + $0x8cc] ss:$20 sps:$4 sm:$0xff]   ;;  %v5176_v33 = vld [vmem:[%s6899_s5 + $0x70] ss:$8 sps:$4 sm:$0xff]  }
 0x1ad   :  { %2978 = vmatprep.subr.bf16.mxu1 %v5059_v34  ;;  %4585 = vmatprep.subr.bf16.mxu0 %v5060_v35  ;;  %v5183_v34 = vld [vmem:[%s6899_s5 + $0x84] ss:$8 sps:$4 sm:$0xff]   ;;  %v5101_v35 = vld [vmem:[%s6896_s3 + $0x8c8] ss:$20 sps:$4 sm:$0xff]  }
 0x1b0   :  { %2979 = vmatpush1.bf16.msra.mxu1 %v5057_v37  ;;  %4586 = vmatpush3.bf16.msra.mxu0 %v5061_v38  ;;  %v5106_v37 = vld [vmem:[%s6896_s3 + $0x8f4] ss:$20 sps:$4 sm:$0xff]  }
 0x1b1   :  { %2980 = vmatprep.subr.bf16.mxu1 %v5064_v40  ;;  %4587 = vmatprep.subr.bf16.mxu0 %v5065_v41  ;;  %v5181_v38 = vld [vmem:[%s6899_s5 + $0x80] ss:$8 sps:$4 sm:$0xff]   ;;  %v5186_v40 = vld [vmem:[%s6899_s5 + $0x94] ss:$8 sps:$4 sm:$0xff]   ;;  %v5104_v41 = vld [vmem:[%s6896_s3 + $0x8f0] ss:$20 sps:$4 sm:$0xff]  }
 0x1b4   :  { %2981 = vmatpush1.bf16.msra.mxu1 %v5062_v42  ;;  %4588 = vmatpush3.bf16.msra.mxu0 %v5066_v44  ;;  %v5109_v42 = vld [vmem:[%s6896_s3 + $0x91c] ss:$20 sps:$4 sm:$0xff]  }
 0x1b5   :  { %2982 = vmatprep.subr.bf16.mxu1 %v5069_v46  ;;  %4589 = vmatprep.subr.bf16.mxu0 %v5070_v48  ;;  %v5184_v44 = vld [vmem:[%s6899_s5 + $0x90] ss:$8 sps:$4 sm:$0xff]   ;;  %v5189_v46 = vld [vmem:[%s6899_s5 + $0xa4] ss:$8 sps:$4 sm:$0xff]  }
 0x1b6   :  { %v5107_v48 = vld [vmem:[%s6896_s3 + $0x918] ss:$20 sps:$4 sm:$0xff]  }
 0x1b8   :  { %2983 = vmatpush1.bf16.msra.mxu1 %v5067_v49  ;;  %4590 = vmatpush3.bf16.msra.mxu0 %v5071_v50  ;;  %v5112_v49 = vld [vmem:[%s6896_s3 + $0x944] ss:$20 sps:$4 sm:$0xff]   ;;  %v5187_v50 = vld [vmem:[%s6899_s5 + $0xa0] ss:$8 sps:$4 sm:$0xff]  }
 0x1b9   :  { %2984 = vmatprep.subr.bf16.mxu1 %v5074_v51  ;;  %4591 = vmatprep.subr.bf16.mxu0 %v5075_v52  ;;  %v5192_v51 = vld [vmem:[%s6899_s5 + $0xb4] ss:$8 sps:$4 sm:$0xff]  }
 0x1ba   :  { %v5110_v52 = vld [vmem:[%s6896_s3 + $0x940] ss:$20 sps:$4 sm:$0xff]  }
 0x1bc   :  { %2985 = vmatpush1.bf16.msra.mxu1 %v5072_v30  ;;  %4592 = vmatpush3.bf16.msra.mxu0 %v5076_v53  ;;  %v5115_v30 = vld [vmem:[%s6896_s3 + $0x96c] ss:$20 sps:$4 sm:$0xff]   ;;  %v5190_v53 = vld [vmem:[%s6899_s5 + $0xb0] ss:$8 sps:$4 sm:$0xff]  }
 0x1bd   :  { %2997 = vmatprep.subr.bf16.mxu1 %v5079_v54  ;;  %3667 = vmatprep.subr.bf16.mxu0 %v5143_v55  ;;  %v5195_v54 = vld [vmem:[%s6899_s5 + $0xc4] ss:$8 sps:$4 sm:$0xff]   ;;  %v5113_v55 = vld [vmem:[%s6896_s3 + $0x968] ss:$20 sps:$4 sm:$0xff]  }
 0x1bf   :  { %2987 = vmatmul.mubr.bf16.vlgmr.msra.gmra.mrb[12].mxu1 %v5860_v36  ;;  %3155 = vmatmul.mubr.bf16.vlgmr.msra.gmra.mrb[16].mxu0 %v5860_v36  ;;  %v5153_v36 = vld [vmem:[%s6899_s5 + $0x24] ss:$8 sps:$4 sm:$0xff]  }
 0x1c0   :  { %2998 = vmatpush1.bf16.msra.mxu1 %v5077_v56  ;;  %3029 = vmatprep.mubr.bf16.mxu1 %v5879_v45  ;;  %v5118_v56 = vld [vmem:[%s6896_s3 + $0x994] ss:$20 sps:$4 sm:$0xff]  }
 0x1c1   :  { %2999 = vmatprep.subr.bf16.mxu1 %v5082_v63  ;;  %3668 = vmatpush1.bf16.msra.mxu0 %v5141_v0  ;;  %v5193_v63 = vld [vmem:[%s6899_s5 + $0xc0] ss:$8 sps:$4 sm:$0xff]   ;;  %v5198_v0 = vld [vmem:[%s6899_s5 + $0xd4] ss:$8 sps:$4 sm:$0xff]  }
 0x1c2   :  { %3669 = vmatprep.subr.bf16.mxu0 %v5148_v1  ;;  %v5116_v1 = vld [vmem:[%s6896_s3 + $0x990] ss:$20 sps:$4 sm:$0xff]  }
 0x1c4   :  { %3000 = vmatpush1.bf16.msra.mxu1 %v5080_v2  ;;  %v5121_v2 = vld [vmem:[%s6896_s3 + $0x9bc] ss:$20 sps:$4 sm:$0xff]  }
 0x1c5   :  { %3001 = vmatprep.subr.bf16.mxu1 %v5085_v4  ;;  %3670 = vmatpush1.bf16.msra.mxu0 %v5146_v5  ;;  %v5196_v4 = vld [vmem:[%s6899_s5 + $0xd0] ss:$8 sps:$4 sm:$0xff]   ;;  %v5201_v5 = vld [vmem:[%s6899_s5 + $0xe4] ss:$8 sps:$4 sm:$0xff]  }
 0x1c6   :  { %3671 = vmatprep.subr.bf16.mxu0 %v5153_v36  ;;  %v5119_v36 = vld [vmem:[%s6896_s3 + $0x9b8] ss:$20 sps:$4 sm:$0xff]  }
 0x1c8   :  { %3002 = vmatpush1.bf16.msra.mxu1 %v5083_v6  ;;  %v5124_v6 = vld [vmem:[%s6896_s3 + $0x9e4] ss:$20 sps:$4 sm:$0xff]  }
 0x1c9   :  { %3003 = vmatprep.subr.bf16.mxu1 %v5088_v7  ;;  %3672 = vmatpush1.bf16.msra.mxu0 %v5151_v8  ;;  %v5199_v7 = vld [vmem:[%s6899_s5 + $0xe0] ss:$8 sps:$4 sm:$0xff]   ;;  %v5204_v8 = vld [vmem:[%s6899_s5 + $0xf4] ss:$8 sps:$4 sm:$0xff]  }
 0x1ca   :  { %3673 = vmatprep.subr.bf16.mxu0 %v5158_v9  ;;  %v5122_v9 = vld [vmem:[%s6896_s3 + $0x9e0] ss:$20 sps:$4 sm:$0xff]  }
 0x1cc   :  { %3004 = vmatpush1.bf16.msra.mxu1 %v5086_v10  ;;  %v5125_v10 = vld [vmem:[%s6896_s3 + $0x3d0] ss:$20 sps:$4 sm:$0xff]  }
 0x1cd   :  { %3005 = vmatprep.subr.bf16.mxu1 %v5091_v11  ;;  %3674 = vmatpush1.bf16.msra.mxu0 %v5156_v59  ;;  %v5202_v11 = vld [vmem:[%s6899_s5 + $0xf0] ss:$8 sps:$4 sm:$0xff]  }
 0x1ce   :  { %3675 = vmatprep.subr.bf16.mxu0 %v5163_v12  ;;  %v5126_v59 = vld [vmem:[%s6896_s3 + $0x290] ss:$20 sps:$4 sm:$0xff]   ;;  %v5127_v12 = vld [vmem:[%s6896_s3 + $0x3f8] ss:$20 sps:$4 sm:$0xff]  }
 0x1d0   :  { %3006 = vmatpush1.bf16.msra.mxu1 %v5089_v13  ;;  %v5128_v13 = vld [vmem:[%s6896_s3 + $0x2b8] ss:$20 sps:$4 sm:$0xff]  }
 0x1d1   :  { %3007 = vmatprep.subr.bf16.mxu1 %v5094_v14  ;;  %3676 = vmatpush1.bf16.msra.mxu0 %v5161_v15  ;;  %v5129_v14 = vld [vmem:[%s6896_s3 + $0x420] ss:$20 sps:$4 sm:$0xff]  }
 0x1d2   :  { %v6440_v19 = vpop.f32.mrb[8].mxu1  ;;  %3677 = vmatprep.subr.bf16.mxu0 %v5168_v16  ;;  %v5130_v15 = vld [vmem:[%s6896_s3 + $0x2e0] ss:$20 sps:$4 sm:$0xff]   ;;  %v5131_v16 = vld [vmem:[%s6896_s3 + $0x448] ss:$20 sps:$4 sm:$0xff]  }
 0x1d3   :  { %v6445_v21 = vpop.f32.mrb[9].mxu1 }
 0x1d4   :  { %3008 = vmatpush1.bf16.msra.mxu1 %v5092_v17  ;;  %v6450_v23 = vpop.f32.mrb[10].mxu1  ;;  %v5133_v17 = vld [vmem:[%s6896_s3 + $0x470] ss:$20 sps:$4 sm:$0xff]  }
 0x1d5   :  { %v6455_v25 = vpop.f32.mrb[11].mxu1  ;;  %3009 = vmatprep.subr.bf16.mxu1 %v5097_v18  ;;  %3678 = vmatpush1.bf16.msra.mxu0 %v5166_v20  ;;  %v5134_v18 = vld [vmem:[%s6896_s3 + $0x330] ss:$20 sps:$4 sm:$0xff]   ;;  %v5135_v20 = vld [vmem:[%s6896_s3 + $0x498] ss:$20 sps:$4 sm:$0xff]  }
 0x1d6   :  { %3679 = vmatprep.subr.bf16.mxu0 %v5173_v22  ;;  %v5136_v22 = vld [vmem:[%s6896_s3 + $0x358] ss:$20 sps:$4 sm:$0xff]  }
 0x1d8   :  { %3010 = vmatpush1.bf16.msra.mxu1 %v5095_v24  ;;  %v5137_v24 = vld [vmem:[%s6896_s3 + $0x4c0] ss:$20 sps:$4 sm:$0xff]  }
 0x1d9   :  { %3011 = vmatprep.subr.bf16.mxu1 %v5100_v27  ;;  %3680 = vmatpush1.bf16.msra.mxu0 %v5171_v26  ;;  %v5138_v27 = vld [vmem:[%s6896_s3 + $0x380] ss:$20 sps:$4 sm:$0xff]   ;;  %v5139_v26 = vld [vmem:[%s6896_s3 + $0x4e8] ss:$20 sps:$4 sm:$0xff]  }
 0x1da   :  { %3681 = vmatprep.subr.bf16.mxu0 %v5178_v28  ;;  %v5207_v28 = vld [vmem:[%s6899_s5 + $0x104] ss:$8 sps:$4 sm:$0xff]  }
 0x1dc   :  { %3012 = vmatpush1.bf16.msra.mxu1 %v5098_v31  ;;  %v5140_v31 = vld [vmem:[%s6896_s3 + $0x3a8] ss:$20 sps:$4 sm:$0xff]  }
 0x1dd   :  { %3013 = vmatprep.subr.bf16.mxu1 %v5103_v39  ;;  %3682 = vmatpush1.bf16.msra.mxu0 %v5176_v33  ;;  %v5144_v39 = vld [vmem:[%s6896_s3 + $0x8d0] ss:$20 sps:$4 sm:$0xff]  }
 0x1de   :  { %3683 = vmatprep.subr.bf16.mxu0 %v5183_v34  ;;  %v5145_v33 = vld [vmem:[%s6896_s3 + $0x790] ss:$20 sps:$4 sm:$0xff]   ;;  %v5149_v34 = vld [vmem:[%s6896_s3 + $0x8f8] ss:$20 sps:$4 sm:$0xff]  }
 0x1e0   :  { %3014 = vmatpush1.bf16.msra.mxu1 %v5101_v35  ;;  %v5150_v35 = vld [vmem:[%s6896_s3 + $0x7b8] ss:$20 sps:$4 sm:$0xff]  }
 0x1e1   :  { %3015 = vmatprep.subr.bf16.mxu1 %v5106_v37  ;;  %3684 = vmatpush1.bf16.msra.mxu0 %v5181_v38  ;;  %v5154_v37 = vld [vmem:[%s6896_s3 + $0x920] ss:$20 sps:$4 sm:$0xff]  }
 0x1e2   :  { %3685 = vmatprep.subr.bf16.mxu0 %v5186_v40  ;;  %v5155_v38 = vld [vmem:[%s6896_s3 + $0x7e0] ss:$20 sps:$4 sm:$0xff]   ;;  %v5164_v40 = vld [vmem:[%s6896_s3 + $0x970] ss:$20 sps:$4 sm:$0xff]  }
 0x1e4   :  { %3016 = vmatpush1.bf16.msra.mxu1 %v5104_v41  ;;  %v5165_v41 = vld [vmem:[%s6896_s3 + $0x830] ss:$20 sps:$4 sm:$0xff]  }
 0x1e5   :  { %3017 = vmatprep.subr.bf16.mxu1 %v5109_v42  ;;  %3686 = vmatpush1.bf16.msra.mxu0 %v5184_v44  ;;  %v5169_v42 = vld [vmem:[%s6896_s3 + $0x998] ss:$20 sps:$4 sm:$0xff]  }
 0x1e6   :  { %3687 = vmatprep.subr.bf16.mxu0 %v5189_v46  ;;  %v5170_v44 = vld [vmem:[%s6896_s3 + $0x858] ss:$20 sps:$4 sm:$0xff]   ;;  %v5174_v46 = vld [vmem:[%s6896_s3 + $0x9c0] ss:$20 sps:$4 sm:$0xff]  }
 0x1e8   :  { %3018 = vmatpush1.bf16.msra.mxu1 %v5107_v48  ;;  %v5175_v48 = vld [vmem:[%s6896_s3 + $0x880] ss:$20 sps:$4 sm:$0xff]  }
 0x1e9   :  { %3019 = vmatprep.subr.bf16.mxu1 %v5112_v49  ;;  %3688 = vmatpush1.bf16.msra.mxu0 %v5187_v50  ;;  %v5179_v49 = vld [vmem:[%s6896_s3 + $0x9e8] ss:$20 sps:$4 sm:$0xff]  }
 0x1ea   :  { %3689 = vmatprep.subr.bf16.mxu0 %v5192_v51  ;;  %v5180_v50 = vld [vmem:[%s6896_s3 + $0x8a8] ss:$20 sps:$4 sm:$0xff]   ;;  %v6675_v51 = vld [vmem:[%s6900_s4] sm:$0x1f] }
 0x1ec   :  { %3020 = vmatpush1.bf16.msra.mxu1 %v5110_v52  ;;  %v1010_v52 = vrot.slane %v6675_v51, %v5731_v58 }
 0x1ed   :  { %3021 = vmatprep.subr.bf16.mxu1 %v5115_v30  ;;  %3690 = vmatpush1.bf16.msra.mxu0 %v5190_v53  ;;  %v1014_v30 = vrot.slane %v6675_v51, %v5740_v61 }
 0x1ee   :  { %3691 = vmatprep.subr.bf16.mxu0 %v5195_v54  ;;  %v2731_v53 = vadd.f32 %v6440_v19, %v1010_v52 }
 0x1ef   :  { %v2733_v54 = vadd.f32 %v6445_v21, %v1014_v30  ;;  %v5205_v21 = vld [vmem:[%s6899_s5 + $0x100] ss:$8 sps:$4 sm:$0xff]  }
 0x1f0   :  { %3022 = vmatpush1.bf16.msra.mxu1 %v5113_v55 }
 0x1f1   :  { %3023 = vmatprep.subr.bf16.mxu1 %v5118_v56  ;;  %3692 = vmatpush1.bf16.msra.mxu0 %v5193_v63  ;;  %v2735_v56 = vadd.f32 %v6450_v23, %v1010_v52  ;;  %v5210_v23 = vld [vmem:[%s6899_s5 + $0x114] ss:$8 sps:$4 sm:$0xff]  }
 0x1f2   :  { %3693 = vmatprep.subr.bf16.mxu0 %v5198_v0  ;;  %v2737_v0 = vadd.f32 %v6455_v25, %v1014_v30  ;;  %v5208_v25 = vld [vmem:[%s6899_s5 + $0x110] ss:$8 sps:$4 sm:$0xff]   ;;  %v5252_v30 = vld [vmem:[%s6899_s5 + $0x1f4] ss:$8 sps:$4 sm:$0xff]  }
 0x1f4   :  { %3024 = vmatpush1.bf16.msra.mxu1 %v5116_v1 }
 0x1f5   :  { %3025 = vmatprep.subr.bf16.mxu1 %v5121_v2  ;;  %3694 = vmatpush1.bf16.msra.mxu0 %v5196_v4 }
 0x1f6   :  { %3695 = vmatprep.subr.bf16.mxu0 %v5201_v5 }
 0x1f8   :  { %3026 = vmatpush1.bf16.msra.mxu1 %v5119_v36 }
 0x1f9   :  { %3027 = vmatprep.subr.bf16.mxu1 %v5124_v6  ;;  %3696 = vmatpush1.bf16.msra.mxu0 %v5199_v7 }
 0x1fa   :  { %3697 = vmatprep.subr.bf16.mxu0 %v5204_v8 }
 0x1fc   :  { %3028 = vmatpush1.bf16.msra.mxu1 %v5122_v9 }
 0x1fd   :  { %4555 = vmatprep.subr.bf16.mxu1 %v5125_v10  ;;  %3698 = vmatpush1.bf16.msra.mxu0 %v5202_v11  ;;  %v5213_v11 = vld [vmem:[%s6899_s5 + $0x124] ss:$8 sps:$4 sm:$0xff]  }
 0x1fe   :  { %3710 = vmatprep.subr.bf16.mxu0 %v5207_v28 }
 0x1ff   :  { %3030 = vmatmul.mubr.bf16.vlgmr.msra.gmra.mrb[12].mxu1 %v5873_v43 }
 0x200   :  { %4556 = vmatpush3.bf16.msra.mxu1 %v5126_v59  ;;  %3113 = vmatprep.mubr.bf16.mxu1 %v5762_v32  ;;  %v5132_v32 = vld [vmem:[%s6896_s3 + $0x308] ss:$20 sps:$4 sm:$0xff]  }
 0x201   :  { %4557 = vmatprep.subr.bf16.mxu1 %v5127_v12  ;;  %v5211_v59 = vld [vmem:[%s6899_s5 + $0x120] ss:$8 sps:$4 sm:$0xff]   ;;  %v5216_v12 = vld [vmem:[%s6899_s5 + $0x134] ss:$8 sps:$4 sm:$0xff]  }
 0x204   :  { %4558 = vmatpush3.bf16.msra.mxu1 %v5128_v13  ;;  %v5214_v13 = vld [vmem:[%s6899_s5 + $0x130] ss:$8 sps:$4 sm:$0xff]  }
 0x205   :  { %4559 = vmatprep.subr.bf16.mxu1 %v5129_v14  ;;  %v5219_v14 = vld [vmem:[%s6899_s5 + $0x144] ss:$8 sps:$4 sm:$0xff]  }
 0x208   :  { %4560 = vmatpush3.bf16.msra.mxu1 %v5130_v15  ;;  %v5217_v15 = vld [vmem:[%s6899_s5 + $0x140] ss:$8 sps:$4 sm:$0xff]  }
 0x209   :  { %4561 = vmatprep.subr.bf16.mxu1 %v5131_v16  ;;  %v5222_v16 = vld [vmem:[%s6899_s5 + $0x154] ss:$8 sps:$4 sm:$0xff]  }
 0x20c   :  { %4562 = vmatpush3.bf16.msra.mxu1 %v5132_v32  ;;  %v5220_v32 = vld [vmem:[%s6899_s5 + $0x150] ss:$8 sps:$4 sm:$0xff]  }
 0x20d   :  { %4563 = vmatprep.subr.bf16.mxu1 %v5133_v17  ;;  %v5225_v17 = vld [vmem:[%s6899_s5 + $0x164] ss:$8 sps:$4 sm:$0xff]  }
 0x210   :  { %4564 = vmatpush3.bf16.msra.mxu1 %v5134_v18 }
 0x211   :  { %4565 = vmatprep.subr.bf16.mxu1 %v5135_v20  ;;  %v5223_v20 = vld [vmem:[%s6899_s5 + $0x160] ss:$8 sps:$4 sm:$0xff]  }
 0x214   :  { %4566 = vmatpush3.bf16.msra.mxu1 %v5136_v22 }
 0x215   :  { %4567 = vmatprep.subr.bf16.mxu1 %v5137_v24  ;;  %v5228_v24 = vld [vmem:[%s6899_s5 + $0x174] ss:$8 sps:$4 sm:$0xff]  }
 0x218   :  { %4568 = vmatpush3.bf16.msra.mxu1 %v5138_v27 }
 0x219   :  { %4569 = vmatprep.subr.bf16.mxu1 %v5139_v26 }
 0x21c   :  { %4570 = vmatpush3.bf16.msra.mxu1 %v5140_v31 }
 0x21d   :  { %4599 = vmatprep.subr.bf16.mxu1 %v5144_v39  ;;  %v5226_v39 = vld [vmem:[%s6899_s5 + $0x170] ss:$8 sps:$4 sm:$0xff]  }
 0x21f   :  { %3114 = vmatmul.mubr.bf16.vlgmr.msra.gmra.mrb[16].mxu1 %v5755_v29  ;;  %v5159_v29 = vld [vmem:[%s6896_s3 + $0x948] ss:$20 sps:$4 sm:$0xff]  }
 0x220   :  { %4600 = vmatpush3.bf16.msra.mxu1 %v5145_v33  ;;  %3195 = vmatprep.mubr.bf16.mxu1 %v5879_v45  ;;  %v5160_v45 = vld [vmem:[%s6896_s3 + $0x808] ss:$20 sps:$4 sm:$0xff]   ;;  %v5231_v33 = vld [vmem:[%s6899_s5 + $0x184] ss:$8 sps:$4 sm:$0xff]  }
 0x221   :  { %4601 = vmatprep.subr.bf16.mxu1 %v5149_v34  ;;  %v5229_v34 = vld [vmem:[%s6899_s5 + $0x180] ss:$8 sps:$4 sm:$0xff]  }
 0x224   :  { %4602 = vmatpush3.bf16.msra.mxu1 %v5150_v35  ;;  %v5234_v35 = vld [vmem:[%s6899_s5 + $0x194] ss:$8 sps:$4 sm:$0xff]  }
 0x225   :  { %4603 = vmatprep.subr.bf16.mxu1 %v5154_v37  ;;  %v5232_v37 = vld [vmem:[%s6899_s5 + $0x190] ss:$8 sps:$4 sm:$0xff]  }
 0x228   :  { %4604 = vmatpush3.bf16.msra.mxu1 %v5155_v38  ;;  %v5237_v38 = vld [vmem:[%s6899_s5 + $0x1a4] ss:$8 sps:$4 sm:$0xff]  }
 0x229   :  { %4605 = vmatprep.subr.bf16.mxu1 %v5159_v29  ;;  %v5235_v29 = vld [vmem:[%s6899_s5 + $0x1a0] ss:$8 sps:$4 sm:$0xff]  }
 0x22c   :  { %4606 = vmatpush3.bf16.msra.mxu1 %v5160_v45  ;;  %v5240_v45 = vld [vmem:[%s6899_s5 + $0x1b4] ss:$8 sps:$4 sm:$0xff]  }
 0x22d   :  { %4607 = vmatprep.subr.bf16.mxu1 %v5164_v40  ;;  %v5238_v40 = vld [vmem:[%s6899_s5 + $0x1b0] ss:$8 sps:$4 sm:$0xff]  }
 0x230   :  { %4608 = vmatpush3.bf16.msra.mxu1 %v5165_v41  ;;  %v5243_v41 = vld [vmem:[%s6899_s5 + $0x1c4] ss:$8 sps:$4 sm:$0xff]  }
 0x231   :  { %4609 = vmatprep.subr.bf16.mxu1 %v5169_v42  ;;  %v5241_v42 = vld [vmem:[%s6899_s5 + $0x1c0] ss:$8 sps:$4 sm:$0xff]  }
 0x234   :  { %4610 = vmatpush3.bf16.msra.mxu1 %v5170_v44  ;;  %v5246_v44 = vld [vmem:[%s6899_s5 + $0x1d4] ss:$8 sps:$4 sm:$0xff]  }
 0x235   :  { %4611 = vmatprep.subr.bf16.mxu1 %v5174_v46  ;;  %v5244_v46 = vld [vmem:[%s6899_s5 + $0x1d0] ss:$8 sps:$4 sm:$0xff]  }
 0x238   :  { %4612 = vmatpush3.bf16.msra.mxu1 %v5175_v48  ;;  %v5249_v48 = vld [vmem:[%s6899_s5 + $0x1e4] ss:$8 sps:$4 sm:$0xff]  }
 0x239   :  { %4613 = vmatprep.subr.bf16.mxu1 %v5179_v49 }
 0x23c   :  { %4614 = vmatpush3.bf16.msra.mxu1 %v5180_v50  ;;  %v5247_v50 = vld [vmem:[%s6899_s5 + $0x1e0] ss:$8 sps:$4 sm:$0xff]  }
 0x23f   :  { %3196 = vmatmul.mubr.bf16.vlgmr.msra.gmra.mrb[20].mxu1 %v5873_v43 }
 0x252   :  { %v2859_v55 = vpop.f32.mrb[8].mxu0 }
 0x253   :  { %v4655_v63 = vadd.f32 %v2859_v55, %v2731_v53  ;;  %v2861_v43 = vpop.f32.mrb[9].mxu0 }
 0x254   :  { %v4657_v1 = vadd.f32 %v2861_v43, %v2733_v54  ;;  %v2863_v2 = vpop.f32.mrb[10].mxu0  ;;  %v5255_v43 = vld [vmem:[%s6899_s5 + $0x204] ss:$8 sps:$4 sm:$0xff]  }
 0x255   :  { %v4659_v4 = vadd.f32 %v2863_v2, %v2735_v56  ;;  %v2865_v5 = vpop.f32.mrb[11].mxu0  ;;  %v3204_v6 = vmax.f32 %v4655_v63, 0.0  ;;  %v5250_v63 = vld [vmem:[%s6899_s5 + $0x1f0] ss:$8 sps:$4 sm:$0xff]   ;;  %v5267_v2 = vld [vmem:[%s6901_s7 + $0x48] sm:$0xff]  }
 0x256   :  { %v4661_v36 = vadd.f32 %v2865_v5, %v2737_v0  ;;  %v3205_v8 = vmax.f32 %v4657_v1, 0.0  ;;  %v5265_v0 = vld [vmem:[%s6901_s7 + $0x40] sm:$0xff]   ;;  %v5269_v5 = vld [vmem:[%s6901_s7 + $0x50] sm:$0xff]  }
 0x257   :  { %v3209_v7 = vmax.f32 %v4659_v4, 0.0  ;;  %v5266_v1 = vld [vmem:[%s6901_s7] sm:$0xff]   ;;  %4621 = vmatprep.subr.bf16.mxu1 %v5265_v0  ;;  %v5268_v4 = vld [vmem:[%s6901_s7 + $0x8] sm:$0xff]   ;;  %v5280_v0 = vld [vmem:[%s6901_s7 + $0x38] sm:$0xff]  }
 0x258   :  { %v3210_v9 = vmax.f32 %v4661_v36, 0.0  ;;  %4622 = vmatpush3.bf16.msra.mxu1 %v5266_v1  ;;  %v5270_v36 = vld [vmem:[%s6901_s7 + $0x10] sm:$0xff]   ;;  %v3291_v1 = vld [vmem:[%s6902_s6] sm:$0x3] }
 0x259   :  { %v3214_v10 = vpack.c.bf16 %v3209_v7, %v3204_v6  ;;  %4623 = vmatprep.subr.bf16.mxu1 %v5267_v2  ;;  %v5271_v6 = vld [vmem:[%s6901_s7 + $0x58] sm:$0xff]   ;;  %v3296_v2 = vrot.slane %v3291_v1, %v5731_v58  ;;  %v5281_v58 = vld [vmem:[%s6903_s9] sm:$0xff]  }
 0x25a   :  { %v3215_v19 = vpack.c.bf16 %v3210_v9, %v3205_v8  ;;  %v5272_v7 = vld [vmem:[%s6901_s7 + $0x18] sm:$0xff]   ;;  %v5273_v8 = vld [vmem:[%s6901_s7 + $0x60] sm:$0xff]  }
 0x25b   :  { %v5274_v9 = vld [vmem:[%s6901_s7 + $0x20] sm:$0xff]  }
 0x25c   :  { %3699 = vmatprep.mubr.bf16.mxu0 %v3215_v19  ;;  %4624 = vmatpush3.bf16.msra.mxu1 %v5268_v4  ;;  %v1018_v19 = vrot.slane %v6675_v51, %v106_v60  ;;  %v5253_v60 = vld [vmem:[%s6899_s5 + $0x200] ss:$8 sps:$4 sm:$0xff]   ;;  %v3300_v4 = vrot.slane %v3291_v1, %v5740_v61  ;;  %v5284_v61 = vmov 0.0  }
 0x25d   :  { %3700 = vmatmul.mubr.bf16.vlgmr.msra.gmra.mrb[20].mxu0 %v3214_v10  ;;  %4625 = vmatprep.subr.bf16.mxu1 %v5269_v5  ;;  %v5275_v10 = vld [vmem:[%s6901_s7 + $0x68] sm:$0xff]  }
 0x25e   :  { %3711 = vmatpush1.bf16.msra.mxu0 %v5205_v21  ;;  %v1022_v21 = vrot.slane %v6675_v51, %v110_v62  ;;  %v5258_v62 = vld [vmem:[%s6899_s5 + $0x214] ss:$8 sps:$4 sm:$0xff]  }
 0x25f   :  { %3712 = vmatprep.subr.bf16.mxu0 %v5210_v23 }
 0x260   :  { %4626 = vmatpush3.bf16.msra.mxu1 %v5270_v36 }
 0x261   :  { %4627 = vmatprep.subr.bf16.mxu1 %v5271_v6 }
 0x262   :  { %3713 = vmatpush1.bf16.msra.mxu0 %v5208_v25 }
 0x263   :  { %3714 = vmatprep.subr.bf16.mxu0 %v5213_v11 }
 0x264   :  { %4628 = vmatpush3.bf16.msra.mxu1 %v5272_v7 }
 0x265   :  { %4629 = vmatprep.subr.bf16.mxu1 %v5273_v8 }
 0x266   :  { %3715 = vmatpush1.bf16.msra.mxu0 %v5211_v59 }
 0x267   :  { %3716 = vmatprep.subr.bf16.mxu0 %v5216_v12 }
 0x268   :  { %4630 = vmatpush3.bf16.msra.mxu1 %v5274_v9 }
 0x269   :  { %4631 = vmatprep.subr.bf16.mxu1 %v5275_v10 }
 0x26a   :  { %3717 = vmatpush1.bf16.msra.mxu0 %v5214_v13 }
 0x26b   :  { %3718 = vmatprep.subr.bf16.mxu0 %v5219_v14 }
 0x26e   :  { %3719 = vmatpush1.bf16.msra.mxu0 %v5217_v15 }
 0x26f   :  { %3720 = vmatprep.subr.bf16.mxu0 %v5222_v16 }
 0x272   :  { %v4549_v18 = vpop.f32.mrb[12].mxu0  ;;  %3721 = vmatpush1.bf16.msra.mxu0 %v5220_v32 }
 0x273   :  { %v4550_v22 = vpop.f32.mrb[13].mxu0  ;;  %3722 = vmatprep.subr.bf16.mxu0 %v5225_v17 }
 0x274   :  { %v6727_v27 = vadd.f32 %v4550_v22, %v4549_v18  ;;  %v4552_v26 = vpop.f32.mrb[14].mxu0 }
 0x275   :  { %v4553_v28 = vpop.f32.mrb[15].mxu0 }
 0x276   :  { %v6729_v31 = vadd.f32 %v4553_v28, %v4552_v26  ;;  %3723 = vmatpush1.bf16.msra.mxu0 %v5223_v20  ;;  %v5261_v26 = vld [vmem:[%s6899_s5 + $0x224] ss:$8 sps:$4 sm:$0xff]   ;;  %v5259_v28 = vld [vmem:[%s6899_s5 + $0x220] ss:$8 sps:$4 sm:$0xff]  }
 0x277   :  { %3724 = vmatprep.subr.bf16.mxu0 %v5228_v24  ;;  %v5256_v24 = vld [vmem:[%s6899_s5 + $0x210] ss:$8 sps:$4 sm:$0xff]  }
 0x27a   :  { %3725 = vmatpush1.bf16.msra.mxu0 %v5226_v39  ;;  %v5264_v39 = vld [vmem:[%s6899_s5 + $0x234] ss:$8 sps:$4 sm:$0xff]  }
 0x27b   :  { %3726 = vmatprep.subr.bf16.mxu0 %v5231_v33  ;;  %v1026_v33 = vrot.slane %v6675_v51, %v114_v47 }
 0x27e   :  { %3727 = vmatpush1.bf16.msra.mxu0 %v5229_v34 }
 0x27f   :  { %3728 = vmatprep.subr.bf16.mxu0 %v5234_v35 }
 0x282   :  { %3729 = vmatpush1.bf16.msra.mxu0 %v5232_v37  ;;  %v3075_v37 = vadd.f32 %v6727_v27, %v1026_v33 }
 0x283   :  { %3730 = vmatprep.subr.bf16.mxu0 %v5237_v38 }
 0x286   :  { %3731 = vmatpush1.bf16.msra.mxu0 %v5235_v29 }
 0x287   :  { %3732 = vmatprep.subr.bf16.mxu0 %v5240_v45 }
 0x28a   :  { %3733 = vmatpush1.bf16.msra.mxu0 %v5238_v40  ;;  %v3078_v40 = vadd.f32 %v6729_v31, %v1026_v33  ;;  %v5276_v31 = vld [vmem:[%s6901_s7 + $0x28] sm:$0xff]  }
 0x28b   :  { %3734 = vmatprep.subr.bf16.mxu0 %v5243_v41  ;;  %4632 = vmatpush3.bf16.msra.mxu1 %v5276_v31 }
 0x28e   :  { %3735 = vmatpush1.bf16.msra.mxu0 %v5241_v42 }
 0x28f   :  { %3736 = vmatprep.subr.bf16.mxu0 %v5246_v44 }
 0x292   :  { %v4593_v49 = vpop.f32.mrb[16].mxu0  ;;  %3737 = vmatpush1.bf16.msra.mxu0 %v5244_v46 }
 0x293   :  { %v4594_v52 = vpop.f32.mrb[17].mxu0  ;;  %3738 = vmatprep.subr.bf16.mxu0 %v5249_v48 }
 0x294   :  { %v6779_v53 = vadd.f32 %v4594_v52, %v4593_v49  ;;  %v4596_v54 = vpop.f32.mrb[18].mxu0 }
 0x295   :  { %v4597_v55 = vpop.f32.mrb[19].mxu0 }
 0x296   :  { %v6781_v56 = vadd.f32 %v4597_v55, %v4596_v54  ;;  %3739 = vmatpush1.bf16.msra.mxu0 %v5247_v50 }
 0x297   :  { %3740 = vmatprep.subr.bf16.mxu0 %v5252_v30 }
 0x29a   :  { %3741 = vmatpush1.bf16.msra.mxu0 %v5250_v63 }
 0x29b   :  { %3753 = vmatprep.subr.bf16.mxu0 %v5255_v43  ;;  %v5279_v43 = vld [vmem:[%s6901_s7 + $0x78] sm:$0xff]  }
 0x2d2   :  { %v3031_v23 = vpop.f32.mrb[12].mxu1 }
 0x2d3   :  { %v4662_v25 = vadd.f32 %v3031_v23, %v1018_v19  ;;  %v3033_v11 = vpop.f32.mrb[13].mxu1 }
 0x2d4   :  { %v4663_v59 = vadd.f32 %v3033_v11, %v1022_v21  ;;  %v3035_v12 = vpop.f32.mrb[14].mxu1 }
 0x2d5   :  { %v4664_v13 = vadd.f32 %v3035_v12, %v1018_v19  ;;  %v3037_v14 = vpop.f32.mrb[15].mxu1  ;;  %v3206_v16 = vmax.f32 %v4662_v25, 0.0 }
 0x2d6   :  { %v4665_v15 = vadd.f32 %v3037_v14, %v1022_v21  ;;  %v3207_v17 = vmax.f32 %v4663_v59, 0.0 }
 0x2d7   :  { %v3211_v32 = vmax.f32 %v4664_v13, 0.0  ;;  %v5282_v13 = vld [vmem:[%s6903_s9 + $0x8] sm:$0xff]  }
 0x2d8   :  { %v3212_v18 = vmax.f32 %v4665_v15, 0.0  ;;  %v4512_v15 = vld [vmem:[%s6904_s8] ss:$0 sm:$0xff] }
 0x2d9   :  { %v3216_v20 = vpack.c.bf16 %v3211_v32, %v3206_v16 }
 0x2da   :  { %v3217_v22 = vpack.c.bf16 %v3212_v18, %v3207_v17 }
 0x2dc   :  { %3742 = vmatprep.mubr.bf16.mxu0 %v3217_v22 }
 0x2dd   :  { %3743 = vmatmul.mubr.bf16.vlgmr.msra.gmra.mrb[20].mxu0 %v3216_v20 }
 0x2de   :  { %3754 = vmatpush1.bf16.msra.mxu0 %v5253_v60  ;;  %3785 = vmatprep.mubr.bf16.mxu0 %v5283_v3  ;;  %v5262_v3 = vld [vmem:[%s6899_s5 + $0x230] ss:$8 sps:$4 sm:$0xff]  }
 0x2df   :  { %3755 = vmatprep.subr.bf16.mxu0 %v5258_v62 }
 0x2e2   :  { %3756 = vmatpush1.bf16.msra.mxu0 %v5256_v24 }
 0x2e3   :  { %3757 = vmatprep.subr.bf16.mxu0 %v5261_v26 }
 0x2e6   :  { %3758 = vmatpush1.bf16.msra.mxu0 %v5259_v28  ;;  %v4529_v28 = vld [vmem:[%s6905_s10] ss:$0 sm:$0xff] }
 0x2e7   :  { %3759 = vmatprep.subr.bf16.mxu0 %v5264_v39 }
 0x2ea   :  { %3760 = vmatpush1.bf16.msra.mxu0 %v5262_v3 }
 0x2eb   :  { %4646 = vmatprep.subr.bf16.mxu0 %v5284_v61 }
 0x2f2   :  { %v4571_v34 = vpop.f32.mrb[16].mxu1 }
 0x2f3   :  { %v4572_v35 = vpop.f32.mrb[17].mxu1 }
 0x2f4   :  { %v4573_v38 = vadd.f32 %v4572_v35, %v4571_v34  ;;  %v4574_v29 = vpop.f32.mrb[18].mxu1 }
 0x2f5   :  { %v4575_v45 = vpop.f32.mrb[19].mxu1 }
 0x2f6   :  { %v3116_v41 = vadd.f32 %v4573_v38, %v3075_v37  ;;  %v4576_v42 = vadd.f32 %v4575_v45, %v4574_v29 }
 0x2f8   :  { %v3119_v44 = vadd.f32 %v4576_v42, %v3078_v40  ;;  %v3157_v46 = vadd.f32 %v6779_v53, %v3116_v41  ;;  %v5277_v53 = vld [vmem:[%s6901_s7 + $0x70] sm:$0xff]  }
 0x2f9   :  { %4633 = vmatprep.subr.bf16.mxu1 %v5277_v53 }
 0x2fa   :  { %v3160_v48 = vadd.f32 %v6781_v56, %v3119_v44  ;;  %v5278_v56 = vld [vmem:[%s6901_s7 + $0x30] sm:$0xff]  }
 0x2fb   :  { %4634 = vmatpush3.bf16.msra.mxu1 %v5278_v56 }
 0x2fc   :  { %4635 = vmatprep.subr.bf16.mxu1 %v5279_v43 }
 0x2ff   :  { %4636 = vmatpush3.bf16.msra.mxu1 %v5280_v0 }
 0x312   :  { %v4615_v49 = vpop.f32.mrb[20].mxu1 }
 0x313   :  { %v4616_v57 = vpop.f32.mrb[21].mxu1 }
 0x314   :  { %v4617_v50 = vadd.f32 %v4616_v57, %v4615_v49  ;;  %v4618_v47 = vpop.f32.mrb[22].mxu1 }
 0x315   :  { %v4619_v51 = vpop.f32.mrb[23].mxu1 }
 0x316   :  { %v3198_v52 = vadd.f32 %v4617_v50, %v3157_v46  ;;  %v4620_v30 = vadd.f32 %v4619_v51, %v4618_v47 }
 0x318   :  { %v3201_v27 = vadd.f32 %v4620_v30, %v3160_v48  ;;  %v3208_v54 = vmax.f32 %v3198_v52, 0.0 }
 0x31a   :  { %v3213_v55 = vmax.f32 %v3201_v27, 0.0 }
 0x31c   :  { %v3218_v63 = vpack.c.bf16 %v3213_v55, %v3208_v54 }
 0x31e   :  { %4511 = vmatmul.mubr.msk.bf16.vlgmr.msra.gmra.mrb[20].mxu0 %vm3663_vm2, %v3218_v63 }
 0x31f   :  { %4647 = vmatpush3.bf16.msra.mxu0 %v5281_v58  ;;  %4650 = vmatprep.mubr.msk.bf16.mxu0 %vm5285_vm3, %v5284_v61 }
 0x320   :  { %4648 = vmatprep.subr.bf16.mxu0 %v5284_v61 }
 0x323   :  { %4649 = vmatpush3.bf16.msra.mxu0 %v5282_v13 }
 0x3f1   :  { %v3787_v5 = vpop.f32.mrb[20].mxu0 }
 0x3f2   :  { %v4666_v36 = vadd.f32 %v3787_v5, %v3296_v2  ;;  %v3789_v6 = vpop.f32.mrb[21].mxu0 }
 0x3f3   :  { %v4667_v7 = vadd.f32 %v3789_v6, %v3300_v4  ;;  %v3791_v8 = vpop.f32.mrb[22].mxu0 }
 0x3f4   :  { %v4668_v9 = vadd.f32 %v3791_v8, %v3296_v2  ;;  %v3793_v10 = vpop.f32.mrb[23].mxu0  ;;  %v3796_v21 = vmax.f32 %v4666_v36, 0.0 }
 0x3f5   :  { %v4669_v19 = vadd.f32 %v3793_v10, %v3300_v4  ;;  %v3797_v25 = vmax.f32 %v4667_v7, 0.0 }
 0x3f6   :  { %v3798_v23 = vmax.f32 %v4668_v9, 0.0 }
 0x3f7   :  { %v3799_v11 = vmax.f32 %v4669_v19, 0.0 }
 0x3f8   :  { %v3800_v59 = vpack.c.bf16 %v3798_v23, %v3796_v21 }
 0x3f9   :  { %v3801_v12 = vpack.c.bf16 %v3799_v11, %v3797_v25 }
 0x3fb   :  { %3969 = vmatprep.mubr.bf16.mxu1 %v3801_v12 }
 0x3fc   :  { %3970 = vmatmul.mubr.bf16.vlgmr.msra.gmra.mrb[24].mxu1 %v3800_v59 }
 0x4cf   :  { %v4637_v14 = vpop.f32.mrb[24].mxu1 }
 0x4d0   :  { %v4638_v16 = vpop.f32.mrb[25].mxu1 }
 0x4d1   :  { %v4639_v32 = vadd.f32 %v4638_v16, %v4637_v14  ;;  %v4640_v17 = vpop.f32.mrb[26].mxu1 }
 0x4d2   :  { %v4641_v18 = vpop.f32.mrb[27].mxu1 }
 0x4d3   :  { %v3972_v20 = vadd.f32 %v4639_v32, %v4512_v15  ;;  %v4642_v22 = vadd.f32 %v4641_v18, %v4640_v17 }
 0x4d5   :  { %v3975_v60 = vadd.f32 %v4642_v22, %v4512_v15  ;;  %v3978_v62 = vmax.f32 %v3972_v20, 0.0 }
 0x4d7   :  { %v3979_v24 = vmax.f32 %v3975_v60, 0.0 }
 0x4d9   :  { %v3980_v26 = vpack.c.bf16 %v3979_v24, %v3978_v62 }
 0x4db   :  { %4651 = vmatmul.mubr.msk.bf16.vlgmr.msra.gmra.mrb[24].mxu0 %vm4004_vm4, %v3980_v26 }
 0x5ae   :  { %v4042_v39 = vpop.f32.mrb[24].mxu0 }
 0x5af   :  { %v4043_v3 = vadd.f32 %v4529_v28, %v4042_v39  ;;  %v4652_v33 = vpop.f32.mrb[25].mxu0 }
 0x5b0   :  { %v4045_v34 = vpop.f32.mrb[26].mxu0 }
 0x5b1   :  { %4049 = vst [vmem:[%s6906_s11] sm:$0xff] %v4043_v3  ;;  %v4046_v35 = vadd.f32 %v4529_v28, %v4045_v34  ;;  %v4653_v37 = vpop.f32.mrb[27].mxu0 }
 0x5b3   :  { %4050 = vst [vmem:[%s6906_s11 + $0x8] sm:$0xff] %v4046_v35 }

</bundles_post_ra>
